<compile_context>
chip_gen: v7x
topology: tpu7x:2x2x1
jax: 0.10.0
libtpu: 0.0.40
codegen_flags: <defaults>
</compile_context>

<pallas_src>
import functools

import jax
import jax.numpy as jnp
from jax.experimental import pallas as pl
from jax.experimental.pallas import tpu as pltpu


# ----------------------------- configuration ------------------------------
LANE = 128                               # TPU lane width; channel dims padded to this
VMEM_LIMIT = 32 * 1024 * 1024            # conservative scoped-VMEM budget (all gens)

IN_CHANS = 1
C0, C1, NUM_CLASSES = 32, 64, 10         # synthetic backbone widths (densenet-style)
STEM_K, STEM_STRIDE, STEM_PAD = 7, 2, 3
BLOCK_K, BLOCK_PAD = 3, 1

# v7x: set to pltpu.CORE_PARALLEL so the per-sample grid is split across the two
# TensorCores. Kept as the portable string here so the script runs on v5e/v6e too.
BATCH_DIM_SEMANTICS = "parallel"


def _round_up(x, m):
    return (x + m - 1) // m * m


# ---------------------------------------------------------------------------
# Fused Pallas kernel: stem conv -> padded scratch -> 3x3 conv (im2col) -> GAP
# ---------------------------------------------------------------------------
def _fused_backbone_kernel(p_ref, w0_ref, b0_ref, wb_ref, bb_ref, o_ref,
                           xpad_ref, xim_ref, *, oh0, ow0, kh, kw):
    """One batch sample per grid step.

    p_ref : (1, oh0*ow0, K0P) bf16   stem im2col patches for this sample
    w0_ref: (K0P, C0P)        bf16   folded conv7x7+BN stem weight
    b0_ref: (1, C0P)          f32    folded stem bias
    wb_ref: (kh*kw*C0P, C1P)  bf16   K-stacked folded conv3x3+BN weight (tap order kj,ki)
    bb_ref: (1, C1P)          f32    folded block bias
    o_ref : (1, 1, C1P)       f32    global-average-pooled features for this sample
    xpad_ref: VMEM (HP, WPP, C0P) bf16   spatially zero-padded stem output
    xim_ref : VMEM (oh0*ow0, kh*kw*C0P) bf16   in-VMEM im2col scratch
    """
    c0p = w0_ref.shape[1]
    hw = oh0 * ow0
    ph, pw = (kh - 1) // 2, (kw - 1) // 2

    # ---- stem conv7x7/2 + folded BN + ReLU: one MXU pass on pre-built patches ----
    y0 = jnp.dot(p_ref[0], w0_ref[...], preferred_element_type=jnp.float32)
    y0 = jnp.maximum(y0 + b0_ref[...], 0.0)                         # (hw, C0P) f32

    # ---- place into the spatially zero-padded VMEM scratch (never touches HBM) ----
    xpad_ref[...] = jnp.zeros_like(xpad_ref)        # cheap; keeps border zero per step
    xpad_ref[ph:ph + oh0, pw:pw + ow0, :] = (
        y0.astype(xpad_ref.dtype).reshape(oh0, ow0, c0p))

    # ---- 3x3 conv: explicit in-VMEM im2col, K-stacked along the lane axis ----
    # Only kw W-shifted slices (kj = 0 aligned; kj = 1,2 masked); ki shifts are free
    # leading-dim slices; the (oh0, ow0, C0P) -> (hw, C0P) reshape is tile-aligned.
    for kj in range(kw):
        xk = xpad_ref[:, kj:kj + ow0, :]             # (HP, ow0, C0P)
        for ki in range(kh):
            t = kj * kh + ki
            xim_ref[:, t * c0p:(t + 1) * c0p] = xk[ki:ki + oh0].reshape(hw, c0p)

    # ---- ONE deep matmul (K = kh*kw*C0P) + folded BN + ReLU ----
    y1 = jnp.dot(xim_ref[...], wb_ref[...], preferred_element_type=jnp.float32)
    y1 = jnp.maximum(y1 + bb_ref[...], 0.0)                         # (hw, C1P) f32

    # ---- fused global average pool (divide = multiply by constant 1/hw) ----
    o_ref[0] = (jnp.sum(y1, axis=0, keepdims=True) * (1.0 / hw)).astype(o_ref.dtype)


def fused_backbone_pallas(patches, w0, b0, wb, bb, *, oh0, ow0, kh, kw):
    """patches: (N, oh0*ow0, K0P) bf16 -> pooled features (N, 1, C1P) f32."""
    n, m0, k0p = patches.shape
    c0p = w0.shape[1]
    kkc, c1p = wb.shape
    assert kkc == kh * kw * c0p and m0 == oh0 * ow0
    hp = oh0 + kh - 1
    wpp = _round_up(ow0 + kw - 1, 16)                # sublane-aligned padded width

    kernel = functools.partial(_fused_backbone_kernel, oh0=oh0, ow0=ow0, kh=kh, kw=kw)
    flops = n * (2 * m0 * k0p * c0p + 2 * m0 * kkc * c1p + m0 * c1p)
    bytes_accessed = int(n * m0 * k0p * 2 + k0p * c0p * 2 + kkc * c1p * 2
                         + (c0p + c1p) * 4 + n * c1p * 4)

    return pl.pallas_call(
        kernel,
        out_shape=jax.ShapeDtypeStruct((n, 1, c1p), jnp.float32),
        grid=(n,),
        in_specs=[
            pl.BlockSpec((1, m0, k0p), lambda i: (i, 0, 0)),
            pl.BlockSpec((k0p, c0p), lambda i: (0, 0)),
            pl.BlockSpec((1, c0p), lambda i: (0, 0)),
            pl.BlockSpec((kkc, c1p), lambda i: (0, 0)),
            pl.BlockSpec((1, c1p), lambda i: (0, 0)),
        ],
        out_specs=pl.BlockSpec((1, 1, c1p), lambda i: (i, 0, 0)),
        scratch_shapes=[
            pltpu.VMEM((hp, wpp, c0p), jnp.bfloat16),          # padded feature map
            pltpu.VMEM((m0, kh * kw * c0p), jnp.bfloat16),     # K-stacked im2col
        ],
        compiler_params=pltpu.CompilerParams(
            dimension_semantics=(BATCH_DIM_SEMANTICS,),
            vmem_limit_bytes=VMEM_LIMIT),
        cost_estimate=pl.CostEstimate(flops=flops, transcendentals=0,
                                      bytes_accessed=bytes_accessed),
    )(patches, w0, b0, wb, bb)


# ---------------------------------------------------------------------------
# Plain-JAX glue: stem im2col (in_chans=1 so it is tiny), BN folding, params
# ---------------------------------------------------------------------------
def im2col_nhwc(x, kh, kw, stride, pad):
    """x: (N,H,W,C) -> ((N, OH*OW, KH*KW*C), OH, OW), patch order (kh, kw, cin)."""
    x_p = jnp.pad(x, ((0, 0), (pad, pad), (pad, pad), (0, 0)))
    n, h, w, c = x_p.shape
    oh = (h - kh) // stride + 1
    ow = (w - kw) // stride + 1
    cols = []
    for i in range(kh):
        for j in range(kw):
            cols.append(x_p[:, i:i + stride * oh:stride, j:j + stride * ow:stride, :])
    patches = jnp.concatenate(cols, axis=-1)                 # (N, OH, OW, KH*KW*C)
    return patches.reshape(n, oh * ow, kh * kw * c), oh, ow


def fold_conv_bn(w_oihw, gamma, beta, mean, var, eps=1e-5):
    """PyTorch conv weight (Cout,Cin,KH,KW) + BN stats -> (KH,KW,Cin,Cout) weight, bias."""
    scale = gamma / jnp.sqrt(var + eps)
    w = jnp.transpose(w_oihw, (2, 3, 1, 0)) * scale[None, None, None, :]
    bias = beta - mean * scale
    return w.astype(jnp.float32), bias.astype(jnp.float32)


def make_params(key, in_chans=1, c0=32, c1=64, num_classes=10):
    ks = jax.random.split(key, 8)
    p = {}
    # stem: conv7x7/2 (bias-free) + BN + ReLU
    p["w0"] = 0.05 * jax.random.normal(ks[0], (c0, in_chans, 7, 7), jnp.float32)
    p["g0"] = 1.0 + 0.01 * jax.random.normal(ks[1], (c0,), jnp.float32)
    p["b0"] = 0.01 * jax.random.normal(ks[2], (c0,), jnp.float32)
    p["m0"] = jnp.zeros((c0,), jnp.float32)
    p["v0"] = jnp.ones((c0,), jnp.float32)
    # block: conv3x3/1 (bias-free) + BN + ReLU
    p["w1"] = 0.05 * jax.random.normal(ks[3], (c1, c0, 3, 3), jnp.float32)
    p["g1"] = 1.0 + 0.01 * jax.random.normal(ks[4], (c1,), jnp.float32)
    p["b1"] = 0.01 * jax.random.normal(ks[5], (c1,), jnp.float32)
    p["m1"] = jnp.zeros((c1,), jnp.float32)
    p["v1"] = jnp.ones((c1,), jnp.float32)
    # classifier head: Linear(c1 -> num_classes)
    p["wh"] = 0.05 * jax.random.normal(ks[6], (num_classes, c1), jnp.float32)
    p["bh"] = 0.01 * jax.random.normal(ks[7], (num_classes,), jnp.float32)
    return p


def prepare_inference_params(params):
    """Fold conv+BN, pad channel dims to LANE, pad stem K only to 64, K-stack the 3x3
    weights in (kj, ki, c0) order to match the in-kernel im2col, cast MXU operands to
    bf16.  Done ONCE outside the jitted forward."""
    c0, in_chans, kh0, kw0 = params["w0"].shape
    c1, _, kh1, kw1 = params["w1"].shape

    c0p, c1p = _round_up(c0, LANE), _round_up(c1, LANE)
    k0 = kh0 * kw0 * in_chans
    k0p = _round_up(k0, 64)          # 49 -> 64, not 128: halves stem-patch HBM bytes

    # stem
    w0, b0 = fold_conv_bn(params["w0"], params["g0"], params["b0"],
                          params["m0"], params["v0"])
    w0_pad = jnp.zeros((k0p, c0p), jnp.float32).at[:k0, :c0].set(w0.reshape(k0, c0))
    b0_pad = jnp.zeros((1, c0p), jnp.float32).at[:, :c0].set(b0[None, :])

    # block: tap order (kj, ki) to match the kernel's kj-outer / ki-inner im2col build
    w1, b1 = fold_conv_bn(params["w1"], params["g1"], params["b1"],
                          params["m1"], params["v1"])          # (kh, kw, c0, c1)
    w1_t = jnp.transpose(w1, (1, 0, 2, 3)).reshape(kw1 * kh1, c0, c1)
    w1_pad = jnp.zeros((kw1 * kh1, c0p, c1p), jnp.float32).at[:, :c0, :c1].set(w1_t)
    w1_flat = w1_pad.reshape(kw1 * kh1 * c0p, c1p)
    b1_pad = jnp.zeros((1, c1p), jnp.float32).at[:, :c1].set(b1[None, :])

    return {
        "w0": w0_pad.astype(jnp.bfloat16), "b0": b0_pad,
        "w1": w1_flat.astype(jnp.bfloat16), "b1": b1_pad,
        # head stays in XLA f32 (hoisted out of the per-sample grid): unpadded weights
        "wh_t": jnp.transpose(params["wh"], (1, 0)),           # (c1, num_classes)
        "bh": params["bh"],
    }


@jax.jit
def rsna24_keypoint_2d_forward(x_nchw, iparams):
    """x: (N, in_chans, H, W) f32 -> (N, NUM_CLASSES) f32 logits."""
    n = x_nchw.shape[0]
    x = jnp.transpose(x_nchw, (0, 2, 3, 1)).astype(jnp.bfloat16)     # NCHW -> NHWC

    # stem im2col stays in XLA: with in_chans=1 the patch matrix is tiny.
    patches, oh0, ow0 = im2col_nhwc(x, STEM_K, STEM_K, STEM_STRIDE, STEM_PAD)
    k0p = iparams["w0"].shape[0]
    patches = jnp.pad(patches, ((0, 0), (0, 0), (0, k0p - patches.shape[-1])))

    # fused: stem conv+BN+ReLU -> conv3x3+BN+ReLU -> GAP, one Pallas kernel
    pooled = fused_backbone_pallas(patches, iparams["w0"], iparams["b0"],
                                   iparams["w1"], iparams["b1"],
                                   oh0=oh0, ow0=ow0, kh=BLOCK_K, kw=BLOCK_K)
    c1 = iparams["wh_t"].shape[0]
    pooled = pooled.reshape(n, -1)[:, :c1].astype(jnp.float32)        # (N, C1)

    # classifier head: single batched (N, C1) @ (C1, NC) matmul, f32, in XLA
    return pooled @ iparams["wh_t"] + iparams["bh"][None, :]


if __name__ == "__main__":
    key = jax.random.PRNGKey(0)
    k_x, k_p = jax.random.split(key)

    # Small shapes consistent with the module: batch=2, in_chans=1, 32x32 image.
    x = jax.random.normal(k_x, (2, IN_CHANS, 32, 32), jnp.float32)
    params = make_params(k_p, in_chans=IN_CHANS, c0=C0, c1=C1, num_classes=NUM_CLASSES)
    iparams = prepare_inference_params(params)     # fold/pad/cast once, outside jit

    out = jax.block_until_ready(rsna24_keypoint_2d_forward(x, iparams))
    assert out.shape == (2, NUM_CLASSES) and out.dtype == jnp.float32
    assert bool(jnp.all(jnp.isfinite(out)))
    print("KERNEL_OK")
</pallas_src>

<mosaic_0001>
module attributes {stable_mosaic.version = 11 : i64} {
  func.func @_fused_backbone_kernel(%arg0: i32, %arg1: memref<1x256x64xbf16, #tpu.memory_space<vmem>>, %arg2: memref<64x128xbf16, #tpu.memory_space<vmem>>, %arg3: memref<1x128xf32, #tpu.memory_space<vmem>>, %arg4: memref<1152x128xbf16, #tpu.memory_space<vmem>>, %arg5: memref<1x128xf32, #tpu.memory_space<vmem>>, %arg6: memref<1x1x128xf32, #tpu.memory_space<vmem>>, %arg7: memref<18x32x128xbf16, #tpu.memory_space<vmem>>, %arg8: memref<256x1152xbf16, #tpu.memory_space<vmem>>) attributes {dimension_semantics = [#tpu.dimension_semantics<parallel>], iteration_bounds = array<i64: 2>, scalar_prefetch = 0 : i64, scratch_operands = 2 : i64, tpu.core_type = #tpu.core_type<tc>, window_params = [{transform_indices = @transform_0, window_bounds = array<i64: 1, 256, 64>}, {pipeline_mode = #tpu.pipeline_mode<synchronous>, transform_indices = @transform_1, window_bounds = array<i64: 64, 128>}, {pipeline_mode = #tpu.pipeline_mode<synchronous>, transform_indices = @transform_2, window_bounds = array<i64: 1, 128>}, {pipeline_mode = #tpu.pipeline_mode<synchronous>, transform_indices = @transform_3, window_bounds = array<i64: 1152, 128>}, {pipeline_mode = #tpu.pipeline_mode<synchronous>, transform_indices = @transform_4, window_bounds = array<i64: 1, 128>}, {transform_indices = @transform_5, window_bounds = array<i64: 1, 1, 128>}]} {
    %c0 = arith.constant 0 : index
    %c0_0 = arith.constant 0 : index
    %c0_1 = arith.constant 0 : index
    %0 = vector.load %arg1[%c0, %c0_0, %c0_1] : memref<1x256x64xbf16, #tpu.memory_space<vmem>>, vector<1x256x64xbf16>
    %1 = vector.shape_cast %0 : vector<1x256x64xbf16> to vector<256x64xbf16>
    %c0_2 = arith.constant 0 : index
    %c0_3 = arith.constant 0 : index
    %2 = vector.load %arg2[%c0_2, %c0_3] : memref<64x128xbf16, #tpu.memory_space<vmem>>, vector<64x128xbf16>
    %cst = arith.constant dense<0.000000e+00> : vector<256x128xf32>
    %3 = tpu.matmul %1, %2, %cst {dimension_numbers = #tpu.dot_dimension_numbers<[1], [0], [0], [1], [0, 0, 1, 1], [], []>} : vector<256x64xbf16>, vector<64x128xbf16>, vector<256x128xf32> -> vector<256x128xf32>
    %c0_4 = arith.constant 0 : index
    %c0_5 = arith.constant 0 : index
    %4 = vector.load %arg3[%c0_4, %c0_5] : memref<1x128xf32, #tpu.memory_space<vmem>>, vector<1x128xf32>
    %5 = vector.broadcast %4 : vector<1x128xf32> to vector<256x128xf32>
    %6 = arith.addf %3, %5 : vector<256x128xf32>
    %cst_6 = arith.constant 0.000000e+00 : f32
    %7 = vector.broadcast %cst_6 : f32 to vector<256x128xf32>
    %8 = arith.maximumf %6, %7 : vector<256x128xf32>
    %cst_7 = arith.constant 0.000000e+00 : bf16
    %9 = vector.broadcast %cst_7 : bf16 to vector<18x32x128xbf16>
    %c0_8 = arith.constant 0 : index
    %c0_9 = arith.constant 0 : index
    %c0_10 = arith.constant 0 : index
    %10 = vector.load %arg7[%c0_8, %c0_9, %c0_10] : memref<18x32x128xbf16, #tpu.memory_space<vmem>>, vector<18x32x128xbf16>
    tpu.vector_store %arg7[%c0_8, %c0_9, %c0_10], %9 {strides = array<i32>} : memref<18x32x128xbf16, #tpu.memory_space<vmem>>, vector<18x32x128xbf16>,
    %11 = arith.truncf %8 : vector<256x128xf32> to vector<256x128xbf16>
    %12 = vector.shape_cast %11 : vector<256x128xbf16> to vector<16x16x128xbf16>
    %c1 = arith.constant 1 : index
    %c1_11 = arith.constant 1 : index
    %c0_12 = arith.constant 0 : index
    %13 = vector.load %arg7[%c1, %c1_11, %c0_12] : memref<18x32x128xbf16, #tpu.memory_space<vmem>>, vector<16x16x128xbf16>
    tpu.vector_store %arg7[%c1, %c1_11, %c0_12], %12 {strides = array<i32>} : memref<18x32x128xbf16, #tpu.memory_space<vmem>>, vector<16x16x128xbf16>,
    %c0_13 = arith.constant 0 : index
    %c0_14 = arith.constant 0 : index
    %c0_15 = arith.constant 0 : index
    %14 = vector.load %arg7[%c0_13, %c0_14, %c0_15] : memref<18x32x128xbf16, #tpu.memory_space<vmem>>, vector<18x16x128xbf16>
    %15 = vector.extract_strided_slice %14 {offsets = [0, 0, 0], sizes = [16, 16, 128], strides = [1, 1, 1]} : vector<18x16x128xbf16> to vector<16x16x128xbf16>
    %16 = vector.shape_cast %15 : vector<16x16x128xbf16> to vector<256x128xbf16>
    %c0_16 = arith.constant 0 : index
    %c0_17 = arith.constant 0 : index
    %17 = vector.load %arg8[%c0_16, %c0_17] : memref<256x1152xbf16, #tpu.memory_space<vmem>>, vector<256x128xbf16>
    tpu.vector_store %arg8[%c0_16, %c0_17], %16 {strides = array<i32>} : memref<256x1152xbf16, #tpu.memory_space<vmem>>, vector<256x128xbf16>,
    %18 = vector.extract_strided_slice %14 {offsets = [1, 0, 0], sizes = [16, 16, 128], strides = [1, 1, 1]} : vector<18x16x128xbf16> to vector<16x16x128xbf16>
    %19 = vector.shape_cast %18 : vector<16x16x128xbf16> to vector<256x128xbf16>
    %c0_18 = arith.constant 0 : index
    %c128 = arith.constant 128 : index
    %20 = vector.load %arg8[%c0_18, %c128] : memref<256x1152xbf16, #tpu.memory_space<vmem>>, vector<256x128xbf16>
    tpu.vector_store %arg8[%c0_18, %c128], %19 {strides = array<i32>} : memref<256x1152xbf16, #tpu.memory_space<vmem>>, vector<256x128xbf16>,
    %21 = vector.extract_strided_slice %14 {offsets = [2, 0, 0], sizes = [16, 16, 128], strides = [1, 1, 1]} : vector<18x16x128xbf16> to vector<16x16x128xbf16>
    %22 = vector.shape_cast %21 : vector<16x16x128xbf16> to vector<256x128xbf16>
    %c0_19 = arith.constant 0 : index
    %c256 = arith.constant 256 : index
    %23 = vector.load %arg8[%c0_19, %c256] : memref<256x1152xbf16, #tpu.memory_space<vmem>>, vector<256x128xbf16>
    tpu.vector_store %arg8[%c0_19, %c256], %22 {strides = array<i32>} : memref<256x1152xbf16, #tpu.memory_space<vmem>>, vector<256x128xbf16>,
    %c0_20 = arith.constant 0 : index
    %c1_21 = arith.constant 1 : index
    %c0_22 = arith.constant 0 : index
    %24 = vector.load %arg7[%c0_20, %c1_21, %c0_22] : memref<18x32x128xbf16, #tpu.memory_space<vmem>>, vector<18x16x128xbf16>
    %25 = vector.extract_strided_slice %24 {offsets = [0, 0, 0], sizes = [16, 16, 128], strides = [1, 1, 1]} : vector<18x16x128xbf16> to vector<16x16x128xbf16>
    %26 = vector.shape_cast %25 : vector<16x16x128xbf16> to vector<256x128xbf16>
    %c0_23 = arith.constant 0 : index
    %c384 = arith.constant 384 : index
    %27 = vector.load %arg8[%c0_23, %c384] : memref<256x1152xbf16, #tpu.memory_space<vmem>>, vector<256x128xbf16>
    tpu.vector_store %arg8[%c0_23, %c384], %26 {strides = array<i32>} : memref<256x1152xbf16, #tpu.memory_space<vmem>>, vector<256x128xbf16>,
    %28 = vector.extract_strided_slice %24 {offsets = [1, 0, 0], sizes = [16, 16, 128], strides = [1, 1, 1]} : vector<18x16x128xbf16> to vector<16x16x128xbf16>
    %29 = vector.shape_cast %28 : vector<16x16x128xbf16> to vector<256x128xbf16>
    %c0_24 = arith.constant 0 : index
    %c512 = arith.constant 512 : index
    %30 = vector.load %arg8[%c0_24, %c512] : memref<256x1152xbf16, #tpu.memory_space<vmem>>, vector<256x128xbf16>
    tpu.vector_store %arg8[%c0_24, %c512], %29 {strides = array<i32>} : memref<256x1152xbf16, #tpu.memory_space<vmem>>, vector<256x128xbf16>,
    %31 = vector.extract_strided_slice %24 {offsets = [2, 0, 0], sizes = [16, 16, 128], strides = [1, 1, 1]} : vector<18x16x128xbf16> to vector<16x16x128xbf16>
    %32 = vector.shape_cast %31 : vector<16x16x128xbf16> to vector<256x128xbf16>
    %c0_25 = arith.constant 0 : index
    %c640 = arith.constant 640 : index
    %33 = vector.load %arg8[%c0_25, %c640] : memref<256x1152xbf16, #tpu.memory_space<vmem>>, vector<256x128xbf16>
    tpu.vector_store %arg8[%c0_25, %c640], %32 {strides = array<i32>} : memref<256x1152xbf16, #tpu.memory_space<vmem>>, vector<256x128xbf16>,
    %c0_26 = arith.constant 0 : index
    %c2 = arith.constant 2 : index
    %c0_27 = arith.constant 0 : index
    %34 = vector.load %arg7[%c0_26, %c2, %c0_27] : memref<18x32x128xbf16, #tpu.memory_space<vmem>>, vector<18x16x128xbf16>
    %35 = vector.extract_strided_slice %34 {offsets = [0, 0, 0], sizes = [16, 16, 128], strides = [1, 1, 1]} : vector<18x16x128xbf16> to vector<16x16x128xbf16>
    %36 = vector.shape_cast %35 : vector<16x16x128xbf16> to vector<256x128xbf16>
    %c0_28 = arith.constant 0 : index
    %c768 = arith.constant 768 : index
    %37 = vector.load %arg8[%c0_28, %c768] : memref<256x1152xbf16, #tpu.memory_space<vmem>>, vector<256x128xbf16>
    tpu.vector_store %arg8[%c0_28, %c768], %36 {strides = array<i32>} : memref<256x1152xbf16, #tpu.memory_space<vmem>>, vector<256x128xbf16>,
    %38 = vector.extract_strided_slice %34 {offsets = [1, 0, 0], sizes = [16, 16, 128], strides = [1, 1, 1]} : vector<18x16x128xbf16> to vector<16x16x128xbf16>
    %39 = vector.shape_cast %38 : vector<16x16x128xbf16> to vector<256x128xbf16>
    %c0_29 = arith.constant 0 : index
    %c896 = arith.constant 896 : index
    %40 = vector.load %arg8[%c0_29, %c896] : memref<256x1152xbf16, #tpu.memory_space<vmem>>, vector<256x128xbf16>
    tpu.vector_store %arg8[%c0_29, %c896], %39 {strides = array<i32>} : memref<256x1152xbf16, #tpu.memory_space<vmem>>, vector<256x128xbf16>,
    %41 = vector.extract_strided_slice %34 {offsets = [2, 0, 0], sizes = [16, 16, 128], strides = [1, 1, 1]} : vector<18x16x128xbf16> to vector<16x16x128xbf16>
    %42 = vector.shape_cast %41 : vector<16x16x128xbf16> to vector<256x128xbf16>
    %c0_30 = arith.constant 0 : index
    %c1024 = arith.constant 1024 : index
    %43 = vector.load %arg8[%c0_30, %c1024] : memref<256x1152xbf16, #tpu.memory_space<vmem>>, vector<256x128xbf16>
    tpu.vector_store %arg8[%c0_30, %c1024], %42 {strides = array<i32>} : memref<256x1152xbf16, #tpu.memory_space<vmem>>, vector<256x128xbf16>,
    %c0_31 = arith.constant 0 : index
    %c0_32 = arith.constant 0 : index
    %44 = vector.load %arg8[%c0_31, %c0_32] : memref<256x1152xbf16, #tpu.memory_space<vmem>>, vector<256x1152xbf16>
    %c0_33 = arith.constant 0 : index
    %c0_34 = arith.constant 0 : index
    %45 = vector.load %arg4[%c0_33, %c0_34] : memref<1152x128xbf16, #tpu.memory_space<vmem>>, vector<1152x128xbf16>
    %cst_35 = arith.constant dense<0.000000e+00> : vector<256x128xf32>
    %46 = tpu.matmul %44, %45, %cst_35 {dimension_numbers = #tpu.dot_dimension_numbers<[1], [0], [0], [1], [0, 0, 1, 1], [], []>} : vector<256x1152xbf16>, vector<1152x128xbf16>, vector<256x128xf32> -> vector<256x128xf32>
    %c0_36 = arith.constant 0 : index
    %c0_37 = arith.constant 0 : index
    %47 = vector.load %arg5[%c0_36, %c0_37] : memref<1x128xf32, #tpu.memory_space<vmem>>, vector<1x128xf32>
    %48 = vector.broadcast %47 : vector<1x128xf32> to vector<256x128xf32>
    %49 = arith.addf %46, %48 : vector<256x128xf32>
    %cst_38 = arith.constant 0.000000e+00 : f32
    %50 = vector.broadcast %cst_38 : f32 to vector<256x128xf32>
    %51 = arith.maximumf %49, %50 : vector<256x128xf32>
    %cst_39 = arith.constant dense<0.000000e+00> : vector<128xf32>
    %52 = vector.multi_reduction <add>, %51, %cst_39 [0] : vector<256x128xf32> to vector<128xf32>
    %53 = vector.shape_cast %52 : vector<128xf32> to vector<1x128xf32>
    %cst_40 = arith.constant 3.906250e-03 : f32
    %54 = vector.broadcast %cst_40 : f32 to vector<1x128xf32>
    %55 = arith.mulf %53, %54 : vector<1x128xf32>
    %c0_41 = arith.constant 0 : index
    %c0_42 = arith.constant 0 : index
    %c0_43 = arith.constant 0 : index
    %56 = vector.load %arg6[%c0_41, %c0_42, %c0_43] : memref<1x1x128xf32, #tpu.memory_space<vmem>>, vector<1x1x128xf32>
    %57 = vector.shape_cast %56 : vector<1x1x128xf32> to vector<1x128xf32>
    %58 = vector.shape_cast %55 : vector<1x128xf32> to vector<1x1x128xf32>
    tpu.vector_store %arg6[%c0_41, %c0_42, %c0_43], %58 {strides = array<i32>} : memref<1x1x128xf32, #tpu.memory_space<vmem>>, vector<1x1x128xf32>,
    return
  }
  func.func @transform_0(%arg0: i32) -> (i32, i32, i32) {
    %c0_i32 = arith.constant 0 : i32
    %c0_i32_0 = arith.constant 0 : i32
    %c0_i32_1 = arith.constant 0 : i32
    return %arg0, %c0_i32, %c0_i32_0 : i32, i32, i32
  }
  func.func @transform_1(%arg0: i32) -> (i32, i32) {
    %c0_i32 = arith.constant 0 : i32
    %c0_i32_0 = arith.constant 0 : i32
    %c0_i32_1 = arith.constant 0 : i32
    return %c0_i32, %c0_i32_0 : i32, i32
  }
  func.func @transform_2(%arg0: i32) -> (i32, i32) {
    %c0_i32 = arith.constant 0 : i32
    %c0_i32_0 = arith.constant 0 : i32
    %c0_i32_1 = arith.constant 0 : i32
    return %c0_i32, %c0_i32_0 : i32, i32
  }
  func.func @transform_3(%arg0: i32) -> (i32, i32) {
    %c0_i32 = arith.constant 0 : i32
    %c0_i32_0 = arith.constant 0 : i32
    %c0_i32_1 = arith.constant 0 : i32
    return %c0_i32, %c0_i32_0 : i32, i32
  }
  func.func @transform_4(%arg0: i32) -> (i32, i32) {
    %c0_i32 = arith.constant 0 : i32
    %c0_i32_0 = arith.constant 0 : i32
    %c0_i32_1 = arith.constant 0 : i32
    return %c0_i32, %c0_i32_0 : i32, i32
  }
  func.func @transform_5(%arg0: i32) -> (i32, i32, i32) {
    %c0_i32 = arith.constant 0 : i32
    %c0_i32_0 = arith.constant 0 : i32
    %c0_i32_1 = arith.constant 0 : i32
    return %arg0, %c0_i32, %c0_i32_0 : i32, i32, i32
  }
}

</mosaic_0001>

<bundles_post_ra>
// kernel: rsna24_keypoint_2d_forward.1
= control target key start
LH: loop header
LB: loop body
LE: loop exit
PB: predicated region body
PF: predicated region fallthrough
CT: control target
= control target key end

     0   :  { %s3999_s18 = smov 0   ;;  %s4964_s0 = inlined_call_operand.vmem [shape: bf16[2,256,64], index: 0, kind: input, shape index: {}]   ;;  %s4965_s1 = inlined_call_operand.vmem [shape: bf16[64,128], index: 1, kind: input, shape index: {}]   ;;  %s4966_s2 = inlined_call_operand.vmem [shape: f32[1,128], index: 2, kind: input, shape index: {}]   ;;  %s4967_s3 = inlined_call_operand.vmem [shape: bf16[1152,128], index: 3, kind: input, shape index: {}]   ;;  %s4968_s4 = inlined_call_operand.vmem [shape: f32[1,128], index: 4, kind: input, shape index: {}]   ;;  %s4969_s5 = inlined_call_operand.vmem [shape: f32[2,1,128], index: 5, kind: output, shape index: {}]  }
   0x1 LB: > { %s3142_s19 = sadd.s32 4294967295, %s3966_s18   ;;  %p3146_p0 = scmp.ge.s32.totalorder %s3966_s18, 1  ;;  %s3966_s18 = sphi %s3999_s18, %s15_s18  }
   0x2   : > { %p187_p1 = scmp.lt.s32.totalorder %s3966_s18, 3 }
   0x4   : > { %p188_p2 = pnand %p3146_p0, %p187_p1 }
   0x5   : > { %v3867_v0 = vld [vmem:[%s4965_s1] sm:$0xff] (!%p188_p2)   ;;  %p213_p3 = scmp.lt.s32.totalorder (!%p188_p2), %s3142_s19, 1  ;;  %v3868_v1 = vld [vmem:[%s4965_s1 + $0x8] sm:$0xff] (!%p188_p2)   ;;  %v3869_v2 = vld [vmem:[%s4965_s1 + $0x10] sm:$0xff] (!%p188_p2)   ;;  %vm373_vm0 = vcmask (!%p188_p2), 523264   ;;  %v3968_v41 = vmov (!%p188_p2), 0  }
   0x6   : > { %191 = sbr.rel (%p188_p2) target bundleno = 806 (0x326), region = 40  ;;  %3754 = vmatprep.subr.bf16.mxu0 (!%p188_p2), %v3867_v0  ;;  %v3870_v4 = vld [vmem:[%s4965_s1 + $0x18] sm:$0xff] (!%p188_p2)   ;;  %v3887_v5 = vld [vmem:[%s4967_s3 + $0xc0] sm:$0xff] (!%p188_p2)   ;;  %v3889_v11 = vld [vmem:[%s4967_s3 + $0xc8] sm:$0xff] (!%p188_p2)   ;;  %620 = vst [vmem:[#allocation2 + $0x28] sm:$0xff] (!%p188_p2), %v3968_v41  ;;  %v1022_v51 = vrot.slane (!%p188_p2), %v3968_v41, 1 }
   0x7   : > { %3755 = vmatpush3.bf16.msra.mxu0 (!%p188_p2), %v3867_v0  ;;  %v3888_v6 = vld [vmem:[%s4967_s3 + $0x80] sm:$0xff] (!%p188_p2)   ;;  %v3890_v12 = vld [vmem:[%s4967_s3 + $0x88] sm:$0xff] (!%p188_p2)   ;;  %v3891_v13 = vld [vmem:[%s4967_s3 + $0xd0] sm:$0xff] (!%p188_p2)   ;;  %615 = vst [vmem:[#allocation2] sm:$0xff] (!%p188_p2), %v3968_v41  ;;  %vm1016_vm1 = vsmask.f32 (!%p188_p2), 7424 }
   0x8   : > { %3756 = vmatprep.subr.bf16.mxu0 (!%p188_p2), %v3868_v1  ;;  %v3892_v14 = vld [vmem:[%s4967_s3 + $0x90] sm:$0xff] (!%p188_p2)   ;;  %v3893_v15 = vld [vmem:[%s4967_s3 + $0xd8] sm:$0xff] (!%p188_p2)   ;;  %v3895_v19 = vld [vmem:[%s4967_s3 + $0xe0] sm:$0xff] (!%p188_p2)   ;;  %616 = vst [vmem:[#allocation2 + $0x8] sm:$0xff] (!%p188_p2), %v3968_v41  ;;  %vm818_vm2 = vcmask (!%p188_p2), 1040384   ;;  %vm812_vm4 = vcmask (!%p188_p2), 1047552  }
   0x9   : > { %v3894_v17 = vld [vmem:[%s4967_s3 + $0x98] sm:$0xff] (!%p188_p2)   ;;  %v3897_v20 = vld [vmem:[%s4967_s3 + $0x40] sm:$0xff] (!%p188_p2)   ;;  %v3899_v23 = vld [vmem:[%s4967_s3 + $0x48] sm:$0xff] (!%p188_p2)   ;;  %618 = vst [vmem:[#allocation2 + $0x18] sm:$0xff] (!%p188_p2), %v3968_v41  ;;  %vm819_vm3 = vsmask.f32 (!%p188_p2), 256 }
   0xa   : > { %v3896_v21 = vld [vmem:[%s4967_s3 + $0xa0] sm:$0xff] (!%p188_p2)   ;;  %3282 = vmatprep.subr.bf16.mxu1 (!%p188_p2), %v3897_v20  ;;  %v3900_v24 = vld [vmem:[%s4967_s3 + $0x8] sm:$0xff] (!%p188_p2)   ;;  %v3903_v34 = vld [vmem:[%s4967_s3 + $0x50] sm:$0xff] (!%p188_p2)   ;;  %622 = vst [vmem:[#allocation2 + $0x38] sm:$0xff] (!%p188_p2), %v3968_v41  ;;  %vm813_vm5 = vsmask.f32 (!%p188_p2), 7938 }
   0xb   : > { %3757 = vmatpush3.bf16.msra.mxu0 (!%p188_p2), %v3868_v1  ;;  %v3898_v22 = vld [vmem:[%s4967_s3] sm:$0xff] (!%p188_p2)   ;;  %v3904_v35 = vld [vmem:[%s4967_s3 + $0x10] sm:$0xff] (!%p188_p2)   ;;  %v3905_v36 = vld [vmem:[%s4967_s3 + $0x58] sm:$0xff] (!%p188_p2)   ;;  %624 = vst [vmem:[#allocation2 + $0x48] sm:$0xff] (!%p188_p2), %v3968_v41  ;;  %vm1367_vm8 = vcmask (!%p188_p2), 1046528  }
   0xc   : > { %3758 = vmatprep.subr.bf16.mxu0 (!%p188_p2), %v3869_v2  ;;  %3283 = vmatpush3.bf16.msra.mxu1 (!%p188_p2), %v3898_v22  ;;  %v3906_v37 = vld [vmem:[%s4967_s3 + $0x18] sm:$0xff] (!%p188_p2)   ;;  %v3909_v38 = vld [vmem:[%s4967_s3 + $0x60] sm:$0xff] (!%p188_p2)   ;;  %v3901_v40 = vld [vmem:[%s4967_s3 + $0xe8] sm:$0xff] (!%p188_p2)   ;;  %626 = vst [vmem:[#allocation2 + $0x58] sm:$0xff] (!%p188_p2), %v3968_v41 }
   0xd   : > { %s4975_s19 = smov (!%p213_p3, %s3142_s19), 1  ;;  %3284 = vmatprep.subr.bf16.mxu1 %v3899_v23  ;;  %v3910_v39 = vld [vmem:[%s4967_s3 + $0x20] sm:$0xff]   ;;  %628 = vst [vmem:[#allocation2 + $0x68] sm:$0xff] %v3968_v41  ;;  %630 = vst [vmem:[#allocation2 + $0x78] sm:$0xff] %v3968_v41  ;;  %v3902_v42 = vld [vmem:[%s4967_s3 + $0xa8] sm:$0xff]  }
   0xe   : > { %s3261_s26 = sshll.u32 %s4975_s19, 7  ;;  %632 = vst [vmem:[#allocation2 + $0x88] sm:$0xff] %v3968_v41  ;;  %634 = vst [vmem:[#allocation2 + $0x98] sm:$0xff] %v3968_v41  ;;  %v3911_v43 = vld [vmem:[%s4967_s3 + $0x68] sm:$0xff]   ;;  %v3907_v45 = vld [vmem:[%s4967_s3 + $0xf0] sm:$0xff]   ;;  %s220_s22 = scalar_lea.vmem %s4969_s5, %s4975_s19 }
   0xf   : > { %s4022_s29 = scalar_lea.vmem %s4964_s0, %s3261_s26  ;;  %3759 = vmatpush3.bf16.msra.mxu0 %v3869_v2  ;;  %636 = vst [vmem:[#allocation2 + $0xa8] sm:$0xff] %v3968_v41  ;;  %638 = vst [vmem:[#allocation2 + $0xb8] sm:$0xff] %v3968_v41  ;;  %v3912_v44 = vld [vmem:[%s4967_s3 + $0x28] sm:$0xff]   ;;  %v3908_v46 = vld [vmem:[%s4967_s3 + $0xb0] sm:$0xff]  }
  0x10   : > { %v3871_v3 = vld [vmem:[%s4022_s29] sm:$0xff]   ;;  %3760 = vmatprep.subr.bf16.mxu0 %v3870_v4  ;;  %v3872_v7 = vld [vmem:[%s4022_s29 + $0x8] sm:$0xff]   ;;  %v3873_v8 = vld [vmem:[%s4022_s29 + $0x10] sm:$0xff]   ;;  %3285 = vmatpush3.bf16.msra.mxu1 %v3900_v24  ;;  %640 = vst [vmem:[#allocation2 + $0xc8] sm:$0xff] %v3968_v41 }
  0x11   : > { %3762 = vmatprep.mubr.msk.bf16.mxu0 %vm373_vm0, %v3871_v3  ;;  %v3874_v9 = vld [vmem:[%s4022_s29 + $0x18] sm:$0xff]   ;;  %v3875_v10 = vld [vmem:[%s4022_s29 + $0x20] sm:$0xff]   ;;  %v3876_v16 = vld [vmem:[%s4022_s29 + $0x28] sm:$0xff]   ;;  %3286 = vmatprep.subr.bf16.mxu1 %v3903_v34  ;;  %642 = vst [vmem:[#allocation2 + $0xd8] sm:$0xff] %v3968_v41 }
  0x12   : > { %v3877_v18 = vld [vmem:[%s4022_s29 + $0x30] sm:$0xff]   ;;  %v3878_v25 = vld [vmem:[%s4022_s29 + $0x38] sm:$0xff]   ;;  %v3879_v26 = vld [vmem:[%s4022_s29 + $0x40] sm:$0xff]   ;;  %644 = vst [vmem:[#allocation2 + $0xe8] sm:$0xff] %v3968_v41 }
  0x13   : > { %3761 = vmatpush3.bf16.msra.mxu0 %v3870_v4  ;;  %v3880_v27 = vld [vmem:[%s4022_s29 + $0x48] sm:$0xff]   ;;  %v3881_v28 = vld [vmem:[%s4022_s29 + $0x50] sm:$0xff]   ;;  %v3882_v29 = vld [vmem:[%s4022_s29 + $0x58] sm:$0xff]   ;;  %646 = vst [vmem:[#allocation2 + $0xf8] sm:$0xff] %v3968_v41 }
  0x14   : > { %3394 = vmatprep.subr.bf16.mxu0 %v3887_v5  ;;  %v3883_v30 = vld [vmem:[%s4022_s29 + $0x60] sm:$0xff]   ;;  %v3884_v31 = vld [vmem:[%s4022_s29 + $0x68] sm:$0xff]   ;;  %v3885_v32 = vld [vmem:[%s4022_s29 + $0x70] sm:$0xff]   ;;  %3287 = vmatpush3.bf16.msra.mxu1 %v3904_v35  ;;  %648 = vst [vmem:[#allocation2 + $0x108] sm:$0xff] %v3968_v41 }
  0x15   : > { %v3886_v33 = vld [vmem:[%s4022_s29 + $0x78] sm:$0xff]   ;;  %3288 = vmatprep.subr.bf16.mxu1 %v3905_v36  ;;  %649 = vst [vmem:[#allocation2 + $0x110] sm:$0xff] %v3968_v41  ;;  %650 = vst [vmem:[#allocation2 + $0x118] sm:$0xff] %v3968_v41  ;;  %v3915_v47 = vld [vmem:[%s4967_s3 + $0x70] sm:$0xff]  }
  0x16   : > { %3763 = vmatmul.mubr.msk.bf16.vlgmr.msra.gmra.mrb[0].mxu0 %vm373_vm0, %v3872_v7  ;;  %v3916_v48 = vld [vmem:[%s4967_s3 + $0x30] sm:$0xff]   ;;  %v981_v49 = vld [vmem:[#allocation2 + $0x8] sm:$0x1]  ;;  %v3913_v50 = vld [vmem:[%s4967_s3 + $0xf8] sm:$0xff]  }
  0x17   : > { %3766 = vmatprep.mubr.msk.bf16.mxu0 %vm373_vm0, %v3873_v8  ;;  %3395 = vmatpush3.bf16.msra.mxu0 %v3888_v6  ;;  %v1025_v52 = vshll.u32 %v981_v49, 16  ;;  %v3914_v53 = vld [vmem:[%s4967_s3 + $0xb8] sm:$0xff]   ;;  %v3919_v58 = vld [vmem:[%s4967_s3 + $0x1c0] sm:$0xff]   ;;  %vm4193_vm6 = vmand %vm818_vm2, %vm819_vm3 }
  0x18   : > { %3396 = vmatprep.subr.bf16.mxu0 %v3889_v11  ;;  %3289 = vmatpush3.bf16.msra.mxu1 %v3906_v37  ;;  %v3917_v54 = vld [vmem:[%s4967_s3 + $0x78] sm:$0xff]   ;;  %v3921_v59 = vld [vmem:[%s4967_s3 + $0x140] sm:$0xff]   ;;  %vm4200_vm7 = vmand %vm812_vm4, %vm813_vm5 }
  0x19   : > { %3290 = vmatprep.subr.bf16.mxu1 %v3909_v38  ;;  %v1027_v55 = vrot.slane %v1025_v52, 1  ;;  %v3918_v56 = vld [vmem:[%s4967_s3 + $0x38] sm:$0xff]   ;;  %v4186_v60 = vld [vmem:[%s4966_s2] ss:$0 sm:$0xff]  ;;  %v3923_v38 = vld [vmem:[%s4967_s3 + $0x1c8] sm:$0xff]  }
  0x1a   : > { %v821_v22 = vld [vmem:[#allocation2 + $0x18] sm:$0x1]  ;;  %v3920_v34 = vld [vmem:[%s4967_s3 + $0x180] sm:$0xff]  }
  0x1b   : > { %3397 = vmatpush3.bf16.msra.mxu0 %v3890_v12  ;;  %v1028_v57 = vsel %vm1016_vm1, %v1022_v51, %v1027_v55  ;;  %v833_v51 = vld [vmem:[#allocation2 + $0x38] sm:$0x1] }
  0x1c   : > { %3398 = vmatprep.subr.bf16.mxu0 %v3891_v13  ;;  %3291 = vmatpush3.bf16.msra.mxu1 %v3910_v39 }
  0x1d   : > { %3292 = vmatprep.subr.bf16.mxu1 %v3911_v43 }
  0x1e   : > { %3767 = vmatmul.mubr.msk.bf16.gmra.mrb[4].mxu0 %vm373_vm0, %v3874_v9 }
  0x1f   : > { %3770 = vmatprep.mubr.msk.bf16.mxu0 %vm373_vm0, %v3875_v10  ;;  %3399 = vmatpush3.bf16.msra.mxu0 %v3892_v14 }
  0x20   : > { %3400 = vmatprep.subr.bf16.mxu0 %v3893_v15  ;;  %3293 = vmatpush3.bf16.msra.mxu1 %v3912_v44  ;;  %v839_v44 = vld [vmem:[#allocation2 + $0x48] sm:$0x1] }
  0x21   : > { %3294 = vmatprep.subr.bf16.mxu1 %v3915_v47 }
  0x23   : > { %3401 = vmatpush3.bf16.msra.mxu0 %v3894_v17 }
  0x24   : > { %3402 = vmatprep.subr.bf16.mxu0 %v3895_v19  ;;  %3295 = vmatpush3.bf16.msra.mxu1 %v3916_v48  ;;  %v3925_v48 = vld [vmem:[%s4967_s3 + $0x148] sm:$0xff]  }
  0x25   : > { %3296 = vmatprep.subr.bf16.mxu1 %v3917_v54  ;;  %v3924_v54 = vld [vmem:[%s4967_s3 + $0x188] sm:$0xff]  }
  0x26   : > { %3771 = vmatmul.mubr.msk.bf16.gmra.mrb[8].mxu0 %vm373_vm0, %v3876_v16  ;;  %v827_v16 = vld [vmem:[#allocation2 + $0x28] sm:$0x1] }
  0x27   : > { %3774 = vmatprep.mubr.msk.bf16.mxu0 %vm373_vm0, %v3877_v18  ;;  %3403 = vmatpush3.bf16.msra.mxu0 %v3896_v21 }
  0x28   : > { %3404 = vmatprep.subr.bf16.mxu0 %v3901_v40  ;;  %3297 = vmatpush3.bf16.msra.mxu1 %v3918_v56 }
  0x29   : > { %3506 = vmatprep.subr.bf16.mxu1 %v3921_v59 }
  0x2b   : > { %3405 = vmatpush3.bf16.msra.mxu0 %v3902_v42  ;;  %v3922_v42 = vld [vmem:[%s4967_s3 + $0x100] sm:$0xff]  }
  0x2c   : > { %3406 = vmatprep.subr.bf16.mxu0 %v3907_v45 }
  0x2e   : > { %3775 = vmatmul.mubr.msk.bf16.gmra.mrb[12].mxu0 %vm373_vm0, %v3878_v25 }
  0x2f   : > { %3778 = vmatprep.mubr.msk.bf16.mxu0 %vm373_vm0, %v3879_v26  ;;  %3407 = vmatpush3.bf16.msra.mxu0 %v3908_v46 }
  0x30   : > { %3408 = vmatprep.subr.bf16.mxu0 %v3913_v50 }
  0x33   : > { %3409 = vmatpush3.bf16.msra.mxu0 %v3914_v53 }
  0x34   : > { %3618 = vmatprep.subr.bf16.mxu0 %v3919_v58 }
  0x36   : > { %3779 = vmatmul.mubr.msk.bf16.gmra.mrb[16].mxu0 %vm373_vm0, %v3880_v27 }
  0x37   : > { %3782 = vmatprep.mubr.msk.bf16.mxu0 %vm373_vm0, %v3881_v28 }
  0x3e   : > { %3783 = vmatmul.mubr.msk.bf16.gmra.mrb[20].mxu0 %vm373_vm0, %v3882_v29 }
  0x3f   : > { %3786 = vmatprep.mubr.msk.bf16.mxu0 %vm373_vm0, %v3883_v30 }
  0x46   : > { %3787 = vmatmul.mubr.msk.bf16.gmra.mrb[24].mxu0 %vm373_vm0, %v3884_v31 }
  0x47   : > { %3790 = vmatprep.mubr.msk.bf16.mxu0 %vm373_vm0, %v3885_v32 }
  0x4e   : > { %3791 = vmatmul.mubr.msk.bf16.gmra.mrb[28].mxu0 %vm373_vm0, %v3886_v33 }
  0x4f   : > { %2412 = vmatprep.mubr.bf16.mxu0 %v1028_v57 }
  0xe9   : > { %v3764_v61 = vpop.f32.mrb[0].mxu0 }
  0xea   : > { %v465_v62 = vadd.f32 %v3764_v61, %v4186_v60  ;;  %v456_v63 = vpop.f32.mrb[1].mxu0  ;;  %v3927_v61 = vld [vmem:[%s4967_s3 + $0x1d0] sm:$0xff]  }
  0xeb   : > { %v457_v0 = vadd.f32 %v4186_v60, %v456_v63  ;;  %v3765_v1 = vpop.f32.mrb[2].mxu0 }
  0xec   : > { %v468_v2 = vadd.f32 %v3765_v1, %v4186_v60  ;;  %v459_v3 = vpop.f32.mrb[3].mxu0  ;;  %v585_v5 = vmax.f32 %v465_v62, 0.0 }
  0xed   : > { %v460_v4 = vadd.f32 %v4186_v60, %v459_v3  ;;  %v583_v7 = vmax.f32 %v457_v0, 0.0 }
  0xee   : > { %v586_v6 = vmax.f32 %v468_v2, 0.0 }
  0xef   : > { %v584_v8 = vmax.f32 %v460_v4, 0.0 }
  0xf0   : > { %v652_v9 = vpack.c.bf16 %v586_v6, %v585_v5 }
  0xf1   : > { %v651_v10 = vpack.c.bf16 %v584_v8, %v583_v7  ;;  %v3768_v11 = vpop.f32.mrb[4].mxu0  ;;  %v3929_v7 = vld [vmem:[%s4967_s3 + $0x150] sm:$0xff]  }
  0xf2   : > { %v675_v12 = vshrl.u32 %v652_v9, 16  ;;  %v481_v13 = vadd.f32 %v3768_v11, %v4186_v60  ;;  %v472_v14 = vpop.f32.mrb[5].mxu0  ;;  %v678_v21 = vshll.u32 %v652_v9, 16 }
  0xf3   : > { %v668_v17 = vshrl.u32 %v651_v10, 16  ;;  %v473_v18 = vadd.f32 %v4186_v60, %v472_v14  ;;  %v3769_v19 = vpop.f32.mrb[6].mxu0  ;;  %v671_v28 = vshll.u32 %v651_v10, 16 }
  0xf4   : > { %v677_v20 = vrot.slane %v675_v12, 7  ;;  %v589_v23 = vmax.f32 %v481_v13, 0.0  ;;  %v484_v24 = vadd.f32 %v3769_v19, %v4186_v60  ;;  %v475_v25 = vpop.f32.mrb[7].mxu0  ;;  %v3928_v13 = vld [vmem:[%s4967_s3 + $0x190] sm:$0xff]  }
  0xf5   : > { %v670_v27 = vrot.slane %v668_v17, 7  ;;  %v587_v29 = vmax.f32 %v473_v18, 0.0  ;;  %v476_v30 = vadd.f32 %v4186_v60, %v475_v25  ;;  %v3930_v25 = vld [vmem:[%s4967_s3 + $0x110] sm:$0xff]  }
  0xf6   : > { %v680_v31 = vor.u32 %v678_v21, %v677_v20  ;;  %v828_v32 = vsel %vm4193_vm6, %v677_v20, %v827_v16  ;;  %v590_v33 = vmax.f32 %v484_v24, 0.0  ;;  %v3931_v20 = vld [vmem:[%s4967_s3 + $0x1d8] sm:$0xff]  }
  0xf7   : > { %829 = vst [vmem:[#allocation2 + $0x28] sm:$0x1] %v828_v32  ;;  %v673_v35 = vor.u32 %v671_v28, %v670_v27  ;;  %v822_v36 = vsel %vm4193_vm6, %v670_v27, %v821_v22  ;;  %v588_v37 = vmax.f32 %v476_v30, 0.0  ;;  %v851_v28 = vld [vmem:[#allocation2 + $0x68] sm:$0x1] }
  0xf8   : > { %v4217_v39 = vsel %vm4200_vm7, %v680_v31, 0  ;;  %823 = vst [vmem:[#allocation2 + $0x18] sm:$0x1] %v822_v36  ;;  %v654_v40 = vpack.c.bf16 %v590_v33, %v589_v23  ;;  %v3933_v33 = vld [vmem:[%s4967_s3 + $0x158] sm:$0xff]  }
  0xf9   : > { %826 = vst [vmem:[#allocation2 + $0x20] sm:$0xff] %v4217_v39  ;;  %v4225_v43 = vsel %vm4200_vm7, %v673_v35, 0  ;;  %v653_v45 = vpack.c.bf16 %v588_v37, %v587_v29  ;;  %v3772_v46 = vpop.f32.mrb[8].mxu0  ;;  %2413 = vmatmul.mubr.bf16.vlgmr.msra.gmra.mrb[32].mxu0 %v4217_v39  ;;  %v1044_v47 = vshll.u32 %v4217_v39, 16  ;;  %v1042_v12 = vshrl.u32 %v4217_v39, 16 }
  0xfa   : > { %817 = vst [vmem:[#allocation2 + $0x10] sm:$0xff] %v4225_v43  ;;  %v689_v49 = vshrl.u32 %v654_v40, 16  ;;  %v692_v50 = vshll.u32 %v654_v40, 16  ;;  %v497_v52 = vadd.f32 %v3772_v46, %v4186_v60  ;;  %v488_v53 = vpop.f32.mrb[9].mxu0  ;;  %2251 = vmatprep.mubr.bf16.mxu1 %v4225_v43  ;;  %3619 = vmatpush3.bf16.msra.mxu0 %v3920_v34  ;;  %v1032_v59 = vshll.u32 %v4225_v43, 16 }
  0xfb   : > { %v682_v55 = vshrl.u32 %v653_v45, 16  ;;  %v685_v56 = vshll.u32 %v653_v45, 16  ;;  %v489_v57 = vadd.f32 %v4186_v60, %v488_v53  ;;  %v3773_v58 = vpop.f32.mrb[10].mxu0  ;;  %2252 = vmatmul.mubr.bf16.vlgmr.msra.gmra.mrb[0].mxu1 %v3968_v41  ;;  %3620 = vmatprep.subr.bf16.mxu0 %v3923_v38  ;;  %v1046_v2 = vrot.slane %v1044_v47, 1  ;;  %v3926_v41 = vld [vmem:[%s4967_s3 + $0x108] sm:$0xff]  }
  0xfc   : > { %v691_v62 = vrot.slane %v689_v49, 7  ;;  %v593_v63 = vmax.f32 %v497_v52, 0.0  ;;  %v500_v0 = vadd.f32 %v3773_v58, %v4186_v60  ;;  %v491_v1 = vpop.f32.mrb[11].mxu0  ;;  %2259 = vmatprep.mubr.bf16.mxu1 %v4217_v39  ;;  %3507 = vmatpush3.bf16.msra.mxu1 %v3922_v42  ;;  %v1034_v6 = vrot.slane %v1032_v59, 1  ;;  %v845_v36 = vld [vmem:[#allocation2 + $0x58] sm:$0x1] }
  0xfd   : > { %v684_v3 = vrot.slane %v682_v55, 7  ;;  %v591_v4 = vmax.f32 %v489_v57, 0.0  ;;  %v492_v5 = vadd.f32 %v4186_v60, %v491_v1  ;;  %3508 = vmatprep.subr.bf16.mxu1 %v3925_v48  ;;  %v1030_v19 = vshrl.u32 %v4225_v43, 16  ;;  %v3932_v48 = vld [vmem:[%s4967_s3 + $0x198] sm:$0xff]   ;;  %v3937_v58 = vld [vmem:[%s4967_s3 + $0x160] sm:$0xff]  }
  0xfe   : > { %v694_v8 = vor.u32 %v692_v50, %v691_v62  ;;  %v840_v9 = vsel %vm4193_vm6, %v691_v62, %v839_v44  ;;  %v594_v10 = vmax.f32 %v500_v0, 0.0  ;;  %v985_v11 = vld [vmem:[#allocation2 + $0x28] sm:$0x1]  ;;  %3621 = vmatpush3.bf16.msra.mxu0 %v3924_v54  ;;  %v1047_v32 = vor.u32 %v1046_v2, %v1042_v12  ;;  %v3935_v54 = vld [vmem:[%s4967_s3 + $0x1e0] sm:$0xff]  }
  0xff   : > { %841 = vst [vmem:[#allocation2 + $0x48] sm:$0x1] %v840_v9  ;;  %v687_v14 = vor.u32 %v685_v56, %v684_v3  ;;  %v834_v16 = vsel %vm4193_vm6, %v684_v3, %v833_v51  ;;  %v592_v17 = vmax.f32 %v492_v5, 0.0  ;;  %v983_v18 = vld [vmem:[#allocation2 + $0x18] sm:$0x1]  ;;  %3622 = vmatprep.subr.bf16.mxu0 %v3927_v61  ;;  %v1049_v24 = vshll.u32 %v985_v11, 16 }
 0x100   : > { %v4267_v21 = vsel %vm4200_vm7, %v694_v8, 0  ;;  %835 = vst [vmem:[#allocation2 + $0x38] sm:$0x1] %v834_v16  ;;  %v656_v22 = vpack.c.bf16 %v594_v10, %v593_v63  ;;  %v1037_v23 = vshll.u32 %v983_v18, 16  ;;  %3509 = vmatpush3.bf16.msra.mxu1 %v3926_v41  ;;  %v1035_v30 = vor.u32 %v1034_v6, %v1030_v19  ;;  %v3938_v9 = vld [vmem:[%s4967_s3 + $0x120] sm:$0xff]   ;;  %v3939_v10 = vld [vmem:[%s4967_s3 + $0x1e8] sm:$0xff]  }
 0x101   : > { %838 = vst [vmem:[#allocation2 + $0x40] sm:$0xff] %v4267_v21  ;;  %v4275_v27 = vsel %vm4200_vm7, %v687_v14, 0  ;;  %v655_v29 = vpack.c.bf16 %v592_v17, %v591_v4  ;;  %v3776_v31 = vpop.f32.mrb[12].mxu0  ;;  %3510 = vmatprep.subr.bf16.mxu1 %v3929_v7  ;;  %v1051_v46 = vrot.slane %v1049_v24, 1  ;;  %v3936_v4 = vld [vmem:[%s4967_s3 + $0x1a0] sm:$0xff]   ;;  %v1068_v8 = vshll.u32 %v4267_v21, 16 }
 0x102   : > { %832 = vst [vmem:[#allocation2 + $0x30] sm:$0xff] %v4275_v27  ;;  %v703_v34 = vshrl.u32 %v656_v22, 16  ;;  %v706_v35 = vshll.u32 %v656_v22, 16  ;;  %v1039_v37 = vrot.slane %v1037_v23, 1  ;;  %v513_v38 = vadd.f32 %v3776_v31, %v4186_v60  ;;  %v504_v40 = vpop.f32.mrb[13].mxu0  ;;  %3623 = vmatpush3.bf16.msra.mxu0 %v3928_v13  ;;  %v3941_v18 = vld [vmem:[%s4967_s3 + $0x168] sm:$0xff]  }
 0x103   : > { %v696_v42 = vshrl.u32 %v655_v29, 16  ;;  %v699_v44 = vshll.u32 %v655_v29, 16  ;;  %v505_v45 = vadd.f32 %v4186_v60, %v504_v40  ;;  %2260 = vmatmul.mubr.bf16.gmra.mrb[4].mxu1 %v4225_v43  ;;  %v3777_v47 = vpop.f32.mrb[14].mxu0  ;;  %3624 = vmatprep.subr.bf16.mxu0 %v3931_v20  ;;  %v3934_v43 = vld [vmem:[%s4967_s3 + $0x118] sm:$0xff]   ;;  %v4307_v62 = vsel %vm1016_vm1, %v1047_v32, %v1051_v46  ;;  %v863_v22 = vld [vmem:[#allocation2 + $0x88] sm:$0x1] }
 0x104   : > { %v705_v49 = vrot.slane %v703_v34, 7  ;;  %v4288_v50 = vsel %vm1016_vm1, %v1035_v30, %v1039_v37  ;;  %v597_v51 = vmax.f32 %v513_v38, 0.0  ;;  %v516_v52 = vadd.f32 %v3777_v47, %v4186_v60  ;;  %2267 = vmatprep.mubr.bf16.mxu1 %v4275_v27  ;;  %v507_v53 = vpop.f32.mrb[15].mxu0  ;;  %3511 = vmatpush3.bf16.msra.mxu1 %v3930_v25  ;;  %v857_v30 = vld [vmem:[#allocation2 + $0x78] sm:$0x1]  ;;  %v3940_v34 = vld [vmem:[%s4967_s3 + $0x1a8] sm:$0xff]  }
 0x105   : > { %v698_v55 = vrot.slane %v696_v42, 7  ;;  %2420 = vmatprep.mubr.bf16.mxu0 %v4288_v50  ;;  %v595_v56 = vmax.f32 %v505_v45, 0.0  ;;  %v508_v57 = vadd.f32 %v4186_v60, %v507_v53  ;;  %3512 = vmatprep.subr.bf16.mxu1 %v3933_v33  ;;  %v1056_v3 = vshll.u32 %v4275_v27, 16  ;;  %v3943_v40 = vld [vmem:[%s4967_s3 + $0x1f0] sm:$0xff]  }
 0x106   : > { %v708_v59 = vor.u32 %v706_v35, %v705_v49  ;;  %v852_v61 = vsel %vm4193_vm6, %v705_v49, %v851_v28  ;;  %2421 = vmatmul.mubr.bf16.gmra.mrb[36].mxu0 %v4275_v27  ;;  %v598_v63 = vmax.f32 %v516_v52, 0.0  ;;  %v1054_v13 = vshrl.u32 %v4275_v27, 16  ;;  %v989_v17 = vld [vmem:[#allocation2 + $0x48] sm:$0x1]  ;;  %v3945_v47 = vld [vmem:[%s4967_s3 + $0x170] sm:$0xff]  }
 0x107   : > { %853 = vst [vmem:[#allocation2 + $0x68] sm:$0x1] %v852_v61  ;;  %v701_v0 = vor.u32 %v699_v44, %v698_v55  ;;  %v846_v1 = vsel %vm4193_vm6, %v698_v55, %v845_v36  ;;  %2428 = vmatprep.mubr.bf16.mxu0 %v4307_v62  ;;  %v596_v2 = vmax.f32 %v508_v57, 0.0  ;;  %v987_v41 = vld [vmem:[#allocation2 + $0x38] sm:$0x1]  ;;  %3625 = vmatpush3.bf16.msra.mxu0 %v3932_v48  ;;  %v1058_v14 = vrot.slane %v1056_v3, 1 }
 0x108   : > { %v4318_v5 = vsel %vm4200_vm7, %v708_v59, 0  ;;  %847 = vst [vmem:[#allocation2 + $0x58] sm:$0x1] %v846_v1  ;;  %v658_v6 = vpack.c.bf16 %v598_v63, %v597_v51  ;;  %v1061_v7 = vshll.u32 %v987_v41, 16  ;;  %3513 = vmatpush3.bf16.msra.mxu1 %v3934_v43  ;;  %3626 = vmatprep.subr.bf16.mxu0 %v3935_v54  ;;  %v1070_v36 = vrot.slane %v1068_v8, 1  ;;  %v3944_v55 = vld [vmem:[%s4967_s3 + $0x1b0] sm:$0xff]  }
 0x109   : > { %850 = vst [vmem:[#allocation2 + $0x60] sm:$0xff] %v4318_v5  ;;  %v4330_v11 = vsel %vm4200_vm7, %v701_v0, 0  ;;  %v657_v12 = vpack.c.bf16 %v596_v2, %v595_v56  ;;  %v3780_v16 = vpop.f32.mrb[16].mxu0  ;;  %3514 = vmatprep.subr.bf16.mxu1 %v3937_v58  ;;  %v1059_v31 = vor.u32 %v1058_v14, %v1054_v13  ;;  %v1073_v37 = vshll.u32 %v989_v17, 16  ;;  %v3946_v61 = vld [vmem:[%s4967_s3 + $0x130] sm:$0xff]   ;;  %v3947_v41 = vld [vmem:[%s4967_s3 + $0x1f8] sm:$0xff]  }
 0x10a   : > { %844 = vst [vmem:[#allocation2 + $0x50] sm:$0xff] %v4330_v11  ;;  %v717_v19 = vshrl.u32 %v658_v6, 16  ;;  %v720_v20 = vshll.u32 %v658_v6, 16  ;;  %v1063_v23 = vrot.slane %v1061_v7, 1  ;;  %v529_v24 = vadd.f32 %v3780_v16, %v4186_v60  ;;  %v520_v25 = vpop.f32.mrb[17].mxu0  ;;  %v3949_v3 = vld [vmem:[%s4967_s3 + $0x178] sm:$0xff]  }
 0x10b   : > { %v710_v28 = vshrl.u32 %v657_v12, 16  ;;  %v713_v29 = vshll.u32 %v657_v12, 16  ;;  %2268 = vmatmul.mubr.bf16.gmra.mrb[8].mxu1 %v4217_v39  ;;  %v521_v32 = vadd.f32 %v4186_v60, %v520_v25  ;;  %v3781_v33 = vpop.f32.mrb[18].mxu0  ;;  %3627 = vmatpush3.bf16.msra.mxu0 %v3936_v4  ;;  %v3942_v39 = vld [vmem:[%s4967_s3 + $0x128] sm:$0xff]   ;;  %v1066_v57 = vshrl.u32 %v4267_v21, 16 }
 0x10c   : > { %v719_v35 = vrot.slane %v717_v19, 7  ;;  %2275 = vmatprep.mubr.bf16.mxu1 %v4267_v21  ;;  %v523_v38 = vpop.f32.mrb[19].mxu0  ;;  %3515 = vmatpush3.bf16.msra.mxu1 %v3938_v9  ;;  %v4351_v44 = vsel %vm1016_vm1, %v1059_v31, %v1063_v23  ;;  %v601_v45 = vmax.f32 %v529_v24, 0.0  ;;  %v532_v46 = vadd.f32 %v3781_v33, %v4186_v60  ;;  %v875_v6 = vld [vmem:[#allocation2 + $0xa8] sm:$0x1]  ;;  %v3950_v24 = vld [vmem:[%s4967_s3 + $0x138] sm:$0xff]  }
 0x10d   : > { %v712_v42 = vrot.slane %v710_v28, 7  ;;  %3628 = vmatprep.subr.bf16.mxu0 %v3939_v10  ;;  %3516 = vmatprep.subr.bf16.mxu1 %v3941_v18  ;;  %v599_v51 = vmax.f32 %v521_v32, 0.0  ;;  %v524_v52 = vadd.f32 %v4186_v60, %v523_v38  ;;  %v1075_v58 = vrot.slane %v1073_v37, 1  ;;  %v869_v14 = vld [vmem:[#allocation2 + $0x98] sm:$0x1]  ;;  %v4405_v31 = vld [vmem:[%s4967_s3 + $0x200] sm:$0xff]  }
 0x10e   : > { %v722_v48 = vor.u32 %v720_v20, %v719_v35  ;;  %v864_v49 = vsel %vm4193_vm6, %v719_v35, %v863_v22  ;;  %2429 = vmatmul.mubr.bf16.gmra.mrb[40].mxu0 %v4267_v21  ;;  %v602_v54 = vmax.f32 %v532_v46, 0.0  ;;  %v1080_v1 = vshll.u32 %v4330_v11, 16  ;;  %v3948_v18 = vld [vmem:[%s4967_s3 + $0x1b8] sm:$0xff]  }
 0x10f   : > { %865 = vst [vmem:[#allocation2 + $0x88] sm:$0x1] %v864_v49  ;;  %v715_v53 = vor.u32 %v713_v29, %v712_v42  ;;  %v858_v43 = vsel %vm4193_vm6, %v712_v42, %v857_v30  ;;  %2436 = vmatprep.mubr.bf16.mxu0 %v4351_v44  ;;  %3629 = vmatpush3.bf16.msra.mxu0 %v3940_v34  ;;  %v600_v59 = vmax.f32 %v524_v52, 0.0  ;;  %v991_v8 = vld [vmem:[#allocation2 + $0x58] sm:$0x1] }
 0x110   : > { %v4369_v56 = vsel %vm4200_vm7, %v722_v48, 0  ;;  %859 = vst [vmem:[#allocation2 + $0x78] sm:$0x1] %v858_v43  ;;  %3517 = vmatpush3.bf16.msra.mxu1 %v3942_v39  ;;  %3630 = vmatprep.subr.bf16.mxu0 %v3943_v40  ;;  %v660_v0 = vpack.c.bf16 %v602_v54, %v601_v45  ;;  %v1071_v4 = vor.u32 %v1070_v36, %v1066_v57  ;;  %v1082_v28 = vrot.slane %v1080_v1, 1  ;;  %v993_v52 = vld [vmem:[#allocation2 + $0x68] sm:$0x1] }
 0x111   : > { %862 = vst [vmem:[#allocation2 + $0x80] sm:$0xff] %v4369_v56  ;;  %v4378_v63 = vsel %vm4200_vm7, %v715_v53, 0  ;;  %v3784_v2 = vpop.f32.mrb[20].mxu0  ;;  %3518 = vmatprep.subr.bf16.mxu1 %v3945_v47  ;;  %v659_v7 = vpack.c.bf16 %v600_v59, %v599_v51  ;;  %v1085_v29 = vshll.u32 %v991_v8, 16  ;;  %v1092_v47 = vshll.u32 %v4318_v5, 16 }
 0x112   : > { %856 = vst [vmem:[#allocation2 + $0x70] sm:$0xff] %v4378_v63  ;;  %v545_v9 = vadd.f32 %v3784_v2, %v4186_v60  ;;  %v536_v10 = vpop.f32.mrb[21].mxu0  ;;  %v731_v12 = vshrl.u32 %v660_v0, 16  ;;  %v734_v13 = vshll.u32 %v660_v0, 16  ;;  %v4395_v19 = vsel %vm1016_vm1, %v1071_v4, %v1075_v58 }
 0x113   : > { %2276 = vmatmul.mubr.bf16.gmra.mrb[12].mxu1 %v4275_v27  ;;  %v537_v16 = vadd.f32 %v4186_v60, %v536_v10  ;;  %v3785_v17 = vpop.f32.mrb[22].mxu0  ;;  %3631 = vmatpush3.bf16.msra.mxu0 %v3944_v55  ;;  %v724_v20 = vshrl.u32 %v659_v7, 16  ;;  %v727_v22 = vshll.u32 %v659_v7, 16  ;;  %v1078_v27 = vshrl.u32 %v4330_v11, 16  ;;  %v887_v55 = vld [vmem:[#allocation2 + $0xc8] sm:$0x1] }
 0x114   : > { %2283 = vmatprep.mubr.bf16.mxu1 %v4330_v11  ;;  %v539_v23 = vpop.f32.mrb[23].mxu0  ;;  %3519 = vmatpush3.bf16.msra.mxu1 %v3946_v61  ;;  %v733_v25 = vrot.slane %v731_v12, 7  ;;  %v605_v30 = vmax.f32 %v545_v9, 0.0  ;;  %v548_v34 = vadd.f32 %v3785_v17, %v4186_v60  ;;  %v1087_v46 = vrot.slane %v1085_v29, 1  ;;  %v881_v7 = vld [vmem:[#allocation2 + $0xb8] sm:$0x1] }
 0x115   : > { %3632 = vmatprep.subr.bf16.mxu0 %v3947_v41  ;;  %3520 = vmatprep.subr.bf16.mxu1 %v3949_v3  ;;  %v726_v32 = vrot.slane %v724_v20, 7  ;;  %v603_v33 = vmax.f32 %v537_v16, 0.0  ;;  %v540_v35 = vadd.f32 %v4186_v60, %v539_v23  ;;  %v1083_v51 = vor.u32 %v1082_v28, %v1078_v27 }
 0x116   : > { %2437 = vmatmul.mubr.bf16.gmra.mrb[44].mxu0 %v4330_v11  ;;  %v736_v36 = vor.u32 %v734_v13, %v733_v25  ;;  %v876_v37 = vsel %vm4193_vm6, %v733_v25, %v875_v6  ;;  %v606_v40 = vmax.f32 %v548_v34, 0.0  ;;  %v1090_v3 = vshrl.u32 %v4318_v5, 16 }
 0x117   : > { %2444 = vmatprep.mubr.bf16.mxu0 %v4395_v19  ;;  %3633 = vmatpush3.bf16.msra.mxu0 %v3948_v18  ;;  %877 = vst [vmem:[#allocation2 + $0xa8] sm:$0x1] %v876_v37  ;;  %v729_v38 = vor.u32 %v727_v22, %v726_v32  ;;  %v870_v39 = vsel %vm4193_vm6, %v726_v32, %v869_v14  ;;  %v604_v42 = vmax.f32 %v540_v35, 0.0  ;;  %v1094_v4 = vrot.slane %v1092_v47, 1  ;;  %v995_v12 = vld [vmem:[#allocation2 + $0x78] sm:$0x1] }
 0x118   : > { %3521 = vmatpush3.bf16.msra.mxu1 %v3950_v24  ;;  %3794 = vmatprep.subr.bf16.mxu0 %v4405_v31  ;;  %v4418_v45 = vsel %vm4200_vm7, %v736_v36, 0  ;;  %871 = vst [vmem:[#allocation2 + $0x98] sm:$0x1] %v870_v39  ;;  %v662_v53 = vpack.c.bf16 %v606_v40, %v605_v30  ;;  %v1097_v6 = vshll.u32 %v993_v52, 16  ;;  %v1104_v13 = vshll.u32 %v4378_v63, 16 }
 0x119   : > { %v3788_v48 = vpop.f32.mrb[24].mxu0  ;;  %3842 = vmatprep.subr.bf16.mxu1 %v4405_v31  ;;  %874 = vst [vmem:[#allocation2 + $0xa0] sm:$0xff] %v4418_v45  ;;  %v4425_v49 = vsel %vm4200_vm7, %v729_v38, 0  ;;  %v661_v43 = vpack.c.bf16 %v604_v42, %v603_v33  ;;  %v1095_v23 = vor.u32 %v1094_v4, %v1090_v3  ;;  %v1109_v33 = vshll.u32 %v995_v12, 16 }
 0x11a   : > { %v552_v54 = vpop.f32.mrb[25].mxu0  ;;  %868 = vst [vmem:[#allocation2 + $0x90] sm:$0xff] %v4425_v49  ;;  %v561_v57 = vadd.f32 %v3788_v48, %v4186_v60  ;;  %v745_v61 = vshrl.u32 %v662_v53, 16  ;;  %v748_v0 = vshll.u32 %v662_v53, 16  ;;  %v1099_v29 = vrot.slane %v1097_v6, 1 }
 0x11b   : > { %2284 = vmatmul.mubr.bf16.gmra.mrb[16].mxu1 %v4267_v21  ;;  %v553_v58 = vadd.f32 %v4186_v60, %v552_v54  ;;  %v3789_v59 = vpop.f32.mrb[26].mxu0  ;;  %v738_v1 = vshrl.u32 %v661_v43, 16  ;;  %v741_v2 = vshll.u32 %v661_v43, 16  ;;  %v4435_v21 = vsel %vm1016_vm1, %v1083_v51, %v1087_v46  ;;  %v899_v43 = vld [vmem:[#allocation2 + $0xe8] sm:$0x1] }
 0x11c   : > { %2291 = vmatprep.mubr.bf16.mxu1 %v4318_v5  ;;  %v555_v41 = vpop.f32.mrb[27].mxu0  ;;  %v747_v8 = vrot.slane %v745_v61, 7  ;;  %v564_v10 = vadd.f32 %v3789_v59, %v4186_v60  ;;  %v609_v14 = vmax.f32 %v561_v57, 0.0  ;;  %v1102_v35 = vshrl.u32 %v4378_v63, 16  ;;  %v893_v54 = vld [vmem:[#allocation2 + $0xd8] sm:$0x1] }
 0x11d   : > { %v740_v9 = vrot.slane %v738_v1, 7  ;;  %v607_v16 = vmax.f32 %v553_v58, 0.0  ;;  %v556_v17 = vadd.f32 %v4186_v60, %v555_v41  ;;  %v1106_v36 = vrot.slane %v1104_v13, 1 }
 0x11e   : > { %2445 = vmatmul.mubr.bf16.gmra.mrb[48].mxu0 %v4318_v5  ;;  %v750_v18 = vor.u32 %v748_v0, %v747_v8  ;;  %v888_v20 = vsel %vm4193_vm6, %v747_v8, %v887_v55  ;;  %v610_v24 = vmax.f32 %v564_v10, 0.0  ;;  %v4462_v52 = vsel %vm1016_vm1, %v1095_v23, %v1099_v29  ;;  %v911_v23 = vld [vmem:[#allocation2 + $0x108] sm:$0x1] }
 0x11f   : > { %2452 = vmatprep.mubr.bf16.mxu0 %v4435_v21  ;;  %v743_v22 = vor.u32 %v741_v2, %v740_v9  ;;  %v882_v27 = vsel %vm4193_vm6, %v740_v9, %v881_v7  ;;  %889 = vst [vmem:[#allocation2 + $0xc8] sm:$0x1] %v888_v20  ;;  %v608_v25 = vmax.f32 %v556_v17, 0.0  ;;  %v1111_v53 = vrot.slane %v1109_v33, 1  ;;  %v997_v7 = vld [vmem:[#allocation2 + $0x88] sm:$0x1] }
 0x120   : > { %883 = vst [vmem:[#allocation2 + $0xb8] sm:$0x1] %v882_v27  ;;  %v4447_v30 = vsel %vm4200_vm7, %v750_v18, 0  ;;  %v664_v37 = vpack.c.bf16 %v610_v24, %v609_v14  ;;  %v1107_v55 = vor.u32 %v1106_v36, %v1102_v35  ;;  %v1116_v61 = vshll.u32 %v4369_v56, 16  ;;  %v905_v24 = vld [vmem:[#allocation2 + $0xf8] sm:$0x1] }
 0x121   : > { %v3792_v28 = vpop.f32.mrb[28].mxu0  ;;  %v4451_v32 = vsel %vm4200_vm7, %v743_v22, 0  ;;  %886 = vst [vmem:[#allocation2 + $0xc0] sm:$0xff] %v4447_v30  ;;  %v663_v38 = vpack.c.bf16 %v608_v25, %v607_v16  ;;  %v1121_v17 = vshll.u32 %v997_v7, 16  ;;  %v1140_v26 = vshll.u32 %v4418_v45, 16 }
 0x122   : > { %v568_v34 = vpop.f32.mrb[29].mxu0  ;;  %880 = vst [vmem:[#allocation2 + $0xb0] sm:$0xff] %v4451_v32  ;;  %v577_v40 = vadd.f32 %v3792_v28, %v4186_v60  ;;  %v759_v47 = vshrl.u32 %v664_v37, 16  ;;  %v762_v48 = vshll.u32 %v664_v37, 16  ;;  %v4485_v14 = vsel %vm1016_vm1, %v1107_v55, %v1111_v53 }
 0x123   : > { %2292 = vmatmul.mubr.bf16.gmra.mrb[20].mxu1 %v4330_v11  ;;  %v3793_v39 = vpop.f32.mrb[30].mxu0  ;;  %v569_v42 = vadd.f32 %v4186_v60, %v568_v34  ;;  %v752_v11 = vshrl.u32 %v663_v38, 16  ;;  %v755_v51 = vshll.u32 %v663_v38, 16  ;;  %v1118_v16 = vrot.slane %v1116_v61, 1 }
 0x124   : > { %2299 = vmatprep.mubr.bf16.mxu1 %v4378_v63  ;;  %v571_v46 = vpop.f32.mrb[31].mxu0  ;;  %v761_v57 = vrot.slane %v759_v47, 7  ;;  %v580_v59 = vadd.f32 %v3793_v39, %v4186_v60  ;;  %v613_v0 = vmax.f32 %v577_v40, 0.0  ;;  %v1123_v33 = vrot.slane %v1121_v17, 1  ;;  %v999_v39 = vld [vmem:[#allocation2 + $0x98] sm:$0x1] }
 0x125   : > { %v754_v58 = vrot.slane %v752_v11, 7  ;;  %v611_v1 = vmax.f32 %v569_v42, 0.0  ;;  %v572_v2 = vadd.f32 %v4186_v60, %v571_v46  ;;  %v1128_v34 = vshll.u32 %v4425_v49, 16 }
 0x126   : > { %2453 = vmatmul.mubr.bf16.gmra.mrb[52].mxu0 %v4378_v63  ;;  %v764_v41 = vor.u32 %v762_v48, %v761_v57  ;;  %v900_v3 = vsel %vm4193_vm6, %v761_v57, %v899_v43  ;;  %v614_v8 = vmax.f32 %v580_v59, 0.0  ;;  %v1133_v47 = vshll.u32 %v999_v39, 16 }
 0x127   : > { %2460 = vmatprep.mubr.bf16.mxu0 %v4462_v52  ;;  %v757_v4 = vor.u32 %v755_v51, %v754_v58  ;;  %v894_v6 = vsel %vm4193_vm6, %v754_v58, %v893_v54  ;;  %901 = vst [vmem:[#allocation2 + $0xe8] sm:$0x1] %v900_v3  ;;  %v612_v9 = vmax.f32 %v572_v2, 0.0  ;;  %v1130_v46 = vrot.slane %v1128_v34, 1  ;;  %v1001_v51 = vld [vmem:[#allocation2 + $0xa8] sm:$0x1] }
 0x128   : > { %895 = vst [vmem:[#allocation2 + $0xd8] sm:$0x1] %v894_v6  ;;  %v4475_v10 = vsel %vm4200_vm7, %v764_v41, 0  ;;  %v666_v12 = vpack.c.bf16 %v614_v8, %v613_v0  ;;  %v1135_v11 = vrot.slane %v1133_v47, 1  ;;  %v1138_v43 = vshrl.u32 %v4418_v45, 16 }
 0x129   : > { %v4479_v60 = vsel %vm4200_vm7, %v757_v4, 0  ;;  %898 = vst [vmem:[#allocation2 + $0xe0] sm:$0xff] %v4475_v10  ;;  %v665_v13 = vpack.c.bf16 %v612_v9, %v611_v1  ;;  %v1142_v54 = vrot.slane %v1140_v26, 1  ;;  %v1145_v55 = vshll.u32 %v1001_v51, 16  ;;  %v1301_v47 = vld [vmem:[#allocation2 + $0x10] sm:$0xfe] }
 0x12a   : > { %892 = vst [vmem:[#allocation2 + $0xd0] sm:$0xff] %v4479_v60  ;;  %v773_v18 = vshrl.u32 %v666_v12, 16  ;;  %v776_v20 = vshll.u32 %v666_v12, 16  ;;  %v1152_v59 = vshll.u32 %v4451_v32, 16  ;;  %v1150_v0 = vshrl.u32 %v4451_v32, 16 }
 0x12b   : > { %2300 = vmatmul.mubr.bf16.gmra.mrb[24].mxu1 %v4318_v5  ;;  %v1114_v5 = vshrl.u32 %v4369_v56, 16  ;;  %v766_v22 = vshrl.u32 %v665_v13, 16  ;;  %v769_v27 = vshll.u32 %v665_v13, 16  ;;  %v1143_v57 = vor.u32 %v1142_v54, %v1138_v43  ;;  %v1299_v51 = vld [vmem:[#allocation2] sm:$0xfe] }
 0x12c   : > { %2307 = vmatprep.mubr.bf16.mxu1 %v4369_v56  ;;  %v775_v25 = vrot.slane %v773_v18, 7  ;;  %v1147_v58 = vrot.slane %v1145_v55, 1  ;;  %v1154_v1 = vrot.slane %v1152_v59, 1  ;;  %v1164_v4 = vshll.u32 %v4447_v30, 16  ;;  %v4576_v43 = vld [vmem:[#allocation2] sm:$0xff] }
 0x12d   : > { %v768_v28 = vrot.slane %v766_v22, 7  ;;  %v1119_v29 = vor.u32 %v1118_v16, %v1114_v5  ;;  %v1162_v7 = vshrl.u32 %v4447_v30, 16  ;;  %v1176_v5 = vshll.u32 %v4479_v60, 16  ;;  %v1304_v59 = vld [vmem:[#allocation2 + $0x28] sm:$0x1] }
 0x12e   : > { %2461 = vmatmul.mubr.bf16.gmra.mrb[56].mxu0 %v4369_v56  ;;  %v778_v35 = vor.u32 %v776_v20, %v775_v25  ;;  %v912_v36 = vsel %vm4193_vm6, %v775_v25, %v911_v23  ;;  %v4527_v61 = vsel %vm1016_vm1, %v1143_v57, %v1147_v58  ;;  %v1155_v41 = vor.u32 %v1154_v1, %v1150_v0  ;;  %v1303_v58 = vld [vmem:[#allocation2 + $0x20] sm:$0xfe] }
 0x12f   : > { %2468 = vmatprep.mubr.bf16.mxu0 %v4485_v14  ;;  %v771_v37 = vor.u32 %v769_v27, %v768_v28  ;;  %v906_v38 = vsel %vm4193_vm6, %v768_v28, %v905_v24  ;;  %913 = vst [vmem:[#allocation2 + $0x108] sm:$0x1] %v912_v36  ;;  %v4509_v15 = vsel %vm1016_vm1, %v1119_v29, %v1123_v33  ;;  %v1166_v8 = vrot.slane %v1164_v4, 1 }
 0x130   : > { %907 = vst [vmem:[#allocation2 + $0xf8] sm:$0x1] %v906_v38  ;;  %v4499_v40 = vsel %vm4200_vm7, %v778_v35, 0  ;;  %v1174_v17 = vshrl.u32 %v4479_v60, 16  ;;  %v1178_v18 = vrot.slane %v1176_v5, 1  ;;  %v1188_v23 = vshll.u32 %v4475_v10, 16 }
 0x131   : > { %v4503_v42 = vsel %vm4200_vm7, %v771_v37, 0  ;;  %910 = vst [vmem:[#allocation2 + $0x100] sm:$0xff] %v4499_v40  ;;  %v1167_v12 = vor.u32 %v1166_v8, %v1162_v7  ;;  %v1186_v25 = vshrl.u32 %v4475_v10, 16  ;;  %v1368_v55 = vrot.slane %v1299_v51, 1  ;;  %v3954_v7 = vld [vmem:[%s4967_s3 + $0x218] sm:$0xff]   ;;  %v3955_v8 = vld [vmem:[%s4967_s3 + $0x220] sm:$0xff]  }
 0x132   : > { %904 = vst [vmem:[#allocation2 + $0xf0] sm:$0xff] %v4503_v42  ;;  %v1179_v22 = vor.u32 %v1178_v18, %v1174_v17  ;;  %v1190_v28 = vrot.slane %v1188_v23, 1  ;;  %v1200_v35 = vshll.u32 %v4503_v42, 16  ;;  %v1198_v37 = vshrl.u32 %v4503_v42, 16  ;;  %v3956_v5 = vld [vmem:[%s4967_s3 + $0x228] sm:$0xff]   ;;  %v3957_v17 = vld [vmem:[%s4967_s3 + $0x230] sm:$0xff]  }
 0x133   : > { %2308 = vmatmul.mubr.bf16.gmra.mrb[28].mxu1 %v4378_v63  ;;  %v1126_v63 = vshrl.u32 %v4425_v49, 16  ;;  %v1375_v1 = vrot.slane %v1304_v59, 1  ;;  %v1309_v18 = vld [vmem:[#allocation2 + $0x50] sm:$0xfe]  ;;  %v1320_v51 = vld [vmem:[#allocation2 + $0xa8] sm:$0x1] }
 0x134   : > { %2315 = vmatprep.mubr.bf16.mxu1 %v4425_v49  ;;  %v1191_v33 = vor.u32 %v1190_v28, %v1186_v25  ;;  %v1202_v38 = vrot.slane %v1200_v35, 1  ;;  %v1312_v25 = vld [vmem:[#allocation2 + $0x68] sm:$0x1] }
 0x135   : > { %v1131_v48 = vor.u32 %v1130_v46, %v1126_v63 }
 0x136   : > { %2469 = vmatmul.mubr.bf16.gmra.mrb[60].mxu0 %v4425_v49  ;;  %v1203_v63 = vor.u32 %v1202_v38, %v1198_v37  ;;  %v1315_v37 = vld [vmem:[#allocation2 + $0x80] sm:$0xfe]  ;;  %v1316_v38 = vld [vmem:[#allocation2 + $0x88] sm:$0x1] }
 0x137   : > { %2476 = vmatprep.mubr.bf16.mxu0 %v4509_v15  ;;  %v4518_v53 = vsel %vm1016_vm1, %v1131_v48, %v1135_v11  ;;  %v1302_v48 = vld [vmem:[#allocation2 + $0x18] sm:$0x1]  ;;  %v1371_v11 = vrot.slane %v1301_v47, 1 }
 0x138   : > { %v1372_v26 = vrot.slane %v1302_v48, 1  ;;  %v1318_v47 = vld [vmem:[#allocation2 + $0x98] sm:$0x1] }
 0x13a   : > { %v1373_v54 = vsel %vm1367_vm8, %v1371_v11, %v1372_v26  ;;  %v1396_v11 = vrot.slane %v1318_v47, 1  ;;  %v1319_v26 = vld [vmem:[#allocation2 + $0xa0] sm:$0xfe] }
 0x13b   : > { %2316 = vmatmul.mubr.bf16.gmra.mrb[32].mxu1 %v4369_v56  ;;  %v1003_v56 = vld [vmem:[#allocation2 + $0xb8] sm:$0x1] }
 0x13c   : > { %2323 = vmatprep.mubr.bf16.mxu1 %v4418_v45  ;;  %v1157_v2 = vshll.u32 %v1003_v56, 16  ;;  %v1374_v56 = vrot.slane %v1303_v58, 1 }
 0x13e   : > { %2477 = vmatmul.mubr.bf16.gmra.mrb[64].mxu0 %v4418_v45  ;;  %v1159_v3 = vrot.slane %v1157_v2, 1  ;;  %v3953_v2 = vld [vmem:[%s4967_s3 + $0x210] sm:$0xff]  }
 0x13f   : > { %2484 = vmatprep.mubr.bf16.mxu0 %v4518_v53 }
 0x140   : > { %v4536_v6 = vsel %vm1016_vm1, %v1155_v41, %v1159_v3  ;;  %v4591_v41 = vsel %vm1367_vm8, %v1374_v56, %v1375_v1  ;;  %v1305_v3 = vld [vmem:[#allocation2 + $0x30] sm:$0xfe]  ;;  %v1324_v56 = vld [vmem:[#allocation2 + $0xc8] sm:$0x1] }
 0x141   : > { %v1377_v4 = vrot.slane %v1305_v3, 1  ;;  %v1405_v1 = vrot.slane %v1324_v56, 1  ;;  %v1273_v56 = vshll.u32 %v4576_v43, 16 }
 0x143   : > { %2324 = vmatmul.mubr.bf16.gmra.mrb[36].mxu1 %v4425_v49  ;;  %v1005_v49 = vld [vmem:[#allocation2 + $0xc8] sm:$0x1] }
 0x144   : > { %2331 = vmatprep.mubr.bf16.mxu1 %v4451_v32  ;;  %v1169_v9 = vshll.u32 %v1005_v49, 16 }
 0x146   : > { %2485 = vmatmul.mubr.bf16.gmra.mrb[68].mxu0 %v4451_v32  ;;  %v1171_v13 = vrot.slane %v1169_v9, 1  ;;  %v1307_v9 = vld [vmem:[#allocation2 + $0x40] sm:$0xfe] }
 0x147   : > { %2492 = vmatprep.mubr.bf16.mxu0 %v4527_v61 }
 0x148   : > { %v4545_v16 = vsel %vm1016_vm1, %v1167_v12, %v1171_v13  ;;  %v1308_v12 = vld [vmem:[#allocation2 + $0x48] sm:$0x1] }
 0x149   : > { %v1381_v13 = vrot.slane %v1308_v12, 1  ;;  %v1325_v12 = vld [vmem:[#allocation2 + $0xd0] sm:$0xfe] }
 0x14b   : > { %2332 = vmatmul.mubr.bf16.gmra.mrb[40].mxu1 %v4418_v45  ;;  %v1007_v45 = vld [vmem:[#allocation2 + $0xd8] sm:$0x1] }
 0x14c   : > { %2339 = vmatprep.mubr.bf16.mxu1 %v4447_v30  ;;  %v1181_v20 = vshll.u32 %v1007_v45, 16 }
 0x14e   : > { %2493 = vmatmul.mubr.bf16.gmra.mrb[72].mxu0 %v4447_v30  ;;  %v1183_v27 = vrot.slane %v1181_v20, 1  ;;  %v1310_v20 = vld [vmem:[#allocation2 + $0x58] sm:$0x1] }
 0x14f   : > { %2500 = vmatprep.mubr.bf16.mxu0 %v4536_v6 }
 0x150   : > { %v4554_v24 = vsel %vm1016_vm1, %v1179_v22, %v1183_v27  ;;  %v1384_v22 = vrot.slane %v1310_v20, 1  ;;  %v3958_v27 = vld [vmem:[%s4967_s3 + $0x238] sm:$0xff]  }
 0x153   : > { %2340 = vmatmul.mubr.bf16.gmra.mrb[44].mxu1 %v4451_v32  ;;  %v1009_v32 = vld [vmem:[#allocation2 + $0xe8] sm:$0x1] }
 0x154   : > { %2347 = vmatprep.mubr.bf16.mxu1 %v4479_v60  ;;  %v1193_v29 = vshll.u32 %v1009_v32, 16  ;;  %v1311_v32 = vld [vmem:[#allocation2 + $0x60] sm:$0xfe] }
 0x155   : > { %v1386_v28 = vrot.slane %v1311_v32, 1 }
 0x156   : > { %2501 = vmatmul.mubr.bf16.gmra.mrb[76].mxu0 %v4479_v60  ;;  %v1195_v34 = vrot.slane %v1193_v29, 1 }
 0x157   : > { %2508 = vmatprep.mubr.bf16.mxu0 %v4545_v16 }
 0x158   : > { %v4563_v36 = vsel %vm1016_vm1, %v1191_v33, %v1195_v34  ;;  %v1313_v33 = vld [vmem:[#allocation2 + $0x70] sm:$0xfe]  ;;  %v1314_v34 = vld [vmem:[#allocation2 + $0x78] sm:$0x1] }
 0x159   : > { %v1389_v35 = vrot.slane %v1313_v33, 1 }
 0x15b   : > { %2348 = vmatmul.mubr.bf16.gmra.mrb[48].mxu1 %v4447_v30  ;;  %v1011_v30 = vld [vmem:[#allocation2 + $0xf8] sm:$0x1] }
 0x15c   : > { %2355 = vmatprep.mubr.bf16.mxu1 %v4475_v10  ;;  %v1205_v39 = vshll.u32 %v1011_v30, 16  ;;  %v1390_v30 = vrot.slane %v1314_v34, 1  ;;  %v1327_v34 = vld [vmem:[#allocation2 + $0xe0] sm:$0xfe] }
 0x15e   : > { %2509 = vmatmul.mubr.bf16.gmra.mrb[80].mxu0 %v4475_v10  ;;  %v1207_v46 = vrot.slane %v1205_v39, 1  ;;  %v1392_v39 = vrot.slane %v1315_v37, 1 }
 0x15f   : > { %2516 = vmatprep.mubr.bf16.mxu0 %v4554_v24 }
 0x163   : > { %2356 = vmatmul.mubr.bf16.gmra.mrb[52].mxu1 %v4479_v60  ;;  %v4571_v60 = vsel %vm1016_vm1, %v1203_v63, %v1207_v46  ;;  %v1393_v63 = vrot.slane %v1316_v38, 1  ;;  %v1317_v46 = vld [vmem:[#allocation2 + $0x90] sm:$0xfe]  ;;  %v1013_v38 = vld [vmem:[#allocation2 + $0x108] sm:$0x1] }
 0x164   : > { %2363 = vmatprep.mubr.bf16.mxu1 %v4503_v42  ;;  %v1395_v48 = vrot.slane %v1317_v46, 1 }
 0x166   : > { %2517 = vmatmul.mubr.bf16.gmra.mrb[84].mxu0 %v4503_v42 }
 0x167   : > { %2524 = vmatprep.mubr.bf16.mxu0 %v4563_v36 }
 0x16b   : > { %2364 = vmatmul.mubr.bf16.gmra.mrb[56].mxu1 %v4475_v10  ;;  %v1300_v10 = vld [vmem:[#allocation2 + $0x8] sm:$0x1] }
 0x16c   : > { %2371 = vmatprep.mubr.bf16.mxu1 %v4499_v40  ;;  %v1369_v57 = vrot.slane %v1300_v10, 1  ;;  %v1398_v10 = vrot.slane %v1319_v26, 1 }
 0x16e   : > { %2525 = vmatmul.mubr.bf16.gmra.mrb[88].mxu0 %v4499_v40  ;;  %v1370_v0 = vsel %vm1367_vm8, %v1368_v55, %v1369_v57  ;;  %v1321_v55 = vld [vmem:[#allocation2 + $0xb0] sm:$0xfe]  ;;  %v1322_v57 = vld [vmem:[#allocation2 + $0xb8] sm:$0x1] }
 0x16f   : > { %2532 = vmatprep.mubr.bf16.mxu0 %v4571_v60  ;;  %v1401_v58 = vrot.slane %v1321_v55, 1  ;;  %v1402_v59 = vrot.slane %v1322_v57, 1  ;;  %v1249_v57 = vshll.u32 %v1013_v38, 16 }
 0x173   : > { %2372 = vmatmul.mubr.bf16.gmra.mrb[60].mxu1 %v4503_v42  ;;  %v3952_v42 = vld [vmem:[%s4967_s3 + $0x208] sm:$0xff]  }
 0x174   : > { %2573 = vmatprep.mubr.bf16.mxu1 %v4307_v62 }
 0x176   : > { %2533 = vmatmul.mubr.bf16.gmra.mrb[92].mxu0 %v4576_v43 }
 0x177   : > { %2734 = vmatprep.mubr.bf16.mxu0 %v1373_v54 }
 0x17b   : > { %2574 = vmatmul.mubr.bf16.vlgmr.msra.gmra.mrb[64].mxu1 %v4288_v50  ;;  %v1306_v50 = vld [vmem:[#allocation2 + $0x38] sm:$0x1] }
 0x17c   : > { %2581 = vmatprep.mubr.bf16.mxu1 %v4351_v44  ;;  %3850 = vmatpush3.bf16.msra.mxu1 %v4405_v31  ;;  %v1378_v49 = vrot.slane %v1306_v50, 1 }
 0x17d   : > { %3843 = vmatprep.subr.bf16.mxu1 %v3952_v42 }
 0x17e   : > { %2735 = vmatmul.mubr.bf16.vlgmr.msra.gmra.mrb[96].mxu0 %v1370_v0 }
 0x17f   : > { %3795 = vmatpush3.bf16.msra.mxu0 %v4405_v31  ;;  %2742 = vmatprep.mubr.bf16.mxu0 %v4591_v41  ;;  %v4601_v31 = vsel %vm1367_vm8, %v1377_v4, %v1378_v49 }
 0x180   : > { %3796 = vmatprep.subr.bf16.mxu0 %v3952_v42  ;;  %3851 = vmatpush3.bf16.msra.mxu1 %v3952_v42 }
 0x181   : > { %3844 = vmatprep.subr.bf16.mxu1 %v3953_v2 }
 0x183   : > { %2582 = vmatmul.mubr.bf16.gmra.mrb[68].mxu1 %v4307_v62  ;;  %3797 = vmatpush3.bf16.msra.mxu0 %v3952_v42  ;;  %v1380_v62 = vrot.slane %v1307_v9, 1  ;;  %v1323_v42 = vld [vmem:[#allocation2 + $0xc0] sm:$0xfe] }
 0x184   : > { %2589 = vmatprep.mubr.bf16.mxu1 %v4395_v19  ;;  %3798 = vmatprep.subr.bf16.mxu0 %v3953_v2  ;;  %v1404_v0 = vrot.slane %v1323_v42, 1 }
 0x185   : > { %3852 = vmatpush3.bf16.msra.mxu1 %v3953_v2  ;;  %v4614_v45 = vsel %vm1367_vm8, %v1380_v62, %v1381_v13 }
 0x186   : > { %2743 = vmatmul.mubr.bf16.gmra.mrb[100].mxu0 %v1373_v54  ;;  %3845 = vmatprep.subr.bf16.mxu1 %v3954_v7  ;;  %v1399_v54 = vrot.slane %v1320_v51, 1 }
 0x187   : > { %2750 = vmatprep.mubr.bf16.mxu0 %v4601_v31  ;;  %3799 = vmatpush3.bf16.msra.mxu0 %v3953_v2 }
 0x188   : > { %3800 = vmatprep.subr.bf16.mxu0 %v3954_v7 }
 0x189   : > { %3853 = vmatpush3.bf16.msra.mxu1 %v3954_v7 }
 0x18a   : > { %3846 = vmatprep.subr.bf16.mxu1 %v3955_v8 }
 0x18b   : > { %2590 = vmatmul.mubr.bf16.gmra.mrb[72].mxu1 %v4351_v44  ;;  %3801 = vmatpush3.bf16.msra.mxu0 %v3954_v7  ;;  %v1383_v44 = vrot.slane %v1309_v18, 1  ;;  %v1326_v7 = vld [vmem:[#allocation2 + $0xd8] sm:$0x1] }
 0x18c   : > { %2597 = vmatprep.mubr.bf16.mxu1 %v4435_v21  ;;  %3802 = vmatprep.subr.bf16.mxu0 %v3955_v8 }
 0x18d   : > { %3854 = vmatpush3.bf16.msra.mxu1 %v3955_v8  ;;  %v4627_v23 = vsel %vm1367_vm8, %v1383_v44, %v1384_v22  ;;  %v1407_v44 = vrot.slane %v1325_v12, 1  ;;  %v1408_v22 = vrot.slane %v1326_v7, 1 }
 0x18e   : > { %2751 = vmatmul.mubr.bf16.gmra.mrb[104].mxu0 %v4591_v41  ;;  %3847 = vmatprep.subr.bf16.mxu1 %v3956_v5 }
 0x18f   : > { %2758 = vmatprep.mubr.bf16.mxu0 %v4614_v45  ;;  %3803 = vmatpush3.bf16.msra.mxu0 %v3955_v8  ;;  %v4682_v8 = vld [vmem:[%s4968_s4] ss:$0 sm:$0xff] }
 0x190   : > { %3804 = vmatprep.subr.bf16.mxu0 %v3956_v5 }
 0x191   : > { %3855 = vmatpush3.bf16.msra.mxu1 %v3956_v5 }
 0x192   : > { %3848 = vmatprep.subr.bf16.mxu1 %v3957_v17 }
 0x193   : > { %2598 = vmatmul.mubr.bf16.gmra.mrb[76].mxu1 %v4395_v19  ;;  %3805 = vmatpush3.bf16.msra.mxu0 %v3956_v5  ;;  %v1387_v19 = vrot.slane %v1312_v25, 1  ;;  %v4692_v25 = vsel %vm1367_vm8, %v1407_v44, %v1408_v22 }
 0x194   : > { %2605 = vmatprep.mubr.bf16.mxu1 %v4462_v52  ;;  %3806 = vmatprep.subr.bf16.mxu0 %v3957_v17 }
 0x195   : > { %3856 = vmatpush3.bf16.msra.mxu1 %v3957_v17  ;;  %v4634_v29 = vsel %vm1367_vm8, %v1386_v28, %v1387_v19 }
 0x196   : > { %2759 = vmatmul.mubr.bf16.gmra.mrb[108].mxu0 %v4601_v31  ;;  %3849 = vmatprep.subr.bf16.mxu1 %v3958_v27 }
 0x197   : > { %2766 = vmatprep.mubr.bf16.mxu0 %v4627_v23  ;;  %3807 = vmatpush3.bf16.msra.mxu0 %v3957_v17 }
 0x198   : > { %3808 = vmatprep.subr.bf16.mxu0 %v3958_v27 }
 0x199   : > { %3857 = vmatpush3.bf16.msra.mxu1 %v3958_v27 }
 0x19b   : > { %2606 = vmatmul.mubr.bf16.gmra.mrb[80].mxu1 %v4435_v21  ;;  %3809 = vmatpush3.bf16.msra.mxu0 %v3958_v27  ;;  %v4641_v21 = vsel %vm1367_vm8, %v1389_v35, %v1390_v30  ;;  %v1328_v35 = vld [vmem:[#allocation2 + $0xe8] sm:$0x1] }
 0x19c   : > { %2613 = vmatprep.mubr.bf16.mxu1 %v4485_v14  ;;  %v1411_v26 = vrot.slane %v1328_v35, 1 }
 0x19e   : > { %2767 = vmatmul.mubr.bf16.gmra.mrb[112].mxu0 %v4614_v45 }
 0x19f   : > { %2774 = vmatprep.mubr.bf16.mxu0 %v4634_v29 }
 0x1a3   : > { %2614 = vmatmul.mubr.bf16.gmra.mrb[84].mxu1 %v4462_v52  ;;  %v4648_v52 = vsel %vm1367_vm8, %v1392_v39, %v1393_v63 }
 0x1a4   : > { %2621 = vmatprep.mubr.bf16.mxu1 %v4509_v15 }
 0x1a6   : > { %2775 = vmatmul.mubr.bf16.gmra.mrb[116].mxu0 %v4627_v23 }
 0x1a7   : > { %2782 = vmatprep.mubr.bf16.mxu0 %v4641_v21 }
 0x1ab   : > { %2622 = vmatmul.mubr.bf16.gmra.mrb[88].mxu1 %v4485_v14  ;;  %v4655_v14 = vsel %vm1367_vm8, %v1395_v48, %v1396_v11  ;;  %v1410_v11 = vrot.slane %v1327_v34, 1 }
 0x1ac   : > { %2629 = vmatprep.mubr.bf16.mxu1 %v4518_v53 }
 0x1ae   : > { %2783 = vmatmul.mubr.bf16.gmra.mrb[120].mxu0 %v4634_v29 }
 0x1af   : > { %2790 = vmatprep.mubr.bf16.mxu0 %v4648_v52 }
 0x1b3   : > { %2630 = vmatmul.mubr.bf16.gmra.mrb[92].mxu1 %v4509_v15  ;;  %v4662_v15 = vsel %vm1367_vm8, %v1398_v10, %v1399_v54  ;;  %v1242_v54 = vshrl.u32 %v4499_v40, 16 }
 0x1b4   : > { %2637 = vmatprep.mubr.bf16.mxu1 %v4527_v61 }
 0x1b6   : > { %2791 = vmatmul.mubr.bf16.gmra.mrb[124].mxu0 %v4641_v21 }
 0x1b7   : > { %2798 = vmatprep.mubr.bf16.mxu0 %v4655_v14 }
 0x1bb   : > { %2638 = vmatmul.mubr.bf16.gmra.mrb[96].mxu1 %v4518_v53  ;;  %v4669_v53 = vsel %vm1367_vm8, %v1401_v58, %v1402_v59 }
 0x1bc   : > { %2645 = vmatprep.mubr.bf16.mxu1 %v4536_v6 }
 0x1be   : > { %2799 = vmatmul.mubr.bf16.gmra.mrb[128].mxu0 %v4648_v52 }
 0x1bf   : > { %2806 = vmatprep.mubr.bf16.mxu0 %v4662_v15 }
 0x1c3   : > { %2646 = vmatmul.mubr.bf16.gmra.mrb[100].mxu1 %v4527_v61  ;;  %v4676_v61 = vsel %vm1367_vm8, %v1404_v0, %v1405_v1  ;;  %v4708_v1 = vsel %vm1367_vm8, %v1410_v11, %v1411_v26 }
 0x1c4   : > { %2653 = vmatprep.mubr.bf16.mxu1 %v4545_v16 }
 0x1c6   : > { %2807 = vmatmul.mubr.bf16.gmra.mrb[132].mxu0 %v4655_v14 }
 0x1c7   : > { %2814 = vmatprep.mubr.bf16.mxu0 %v4669_v53 }
 0x1cb   : > { %2654 = vmatmul.mubr.bf16.gmra.mrb[104].mxu1 %v4536_v6 }
 0x1cc   : > { %v3410_v2 = vpop.f32.mrb[32].mxu0  ;;  %2661 = vmatprep.mubr.bf16.mxu1 %v4554_v24 }
 0x1cd   : > { %v3411_v3 = vpop.f32.mrb[33].mxu0 }
 0x1ce   : > { %2815 = vmatmul.mubr.bf16.gmra.mrb[136].mxu0 %v4662_v15  ;;  %v3412_v50 = vadd.f32 %v3411_v3, %v3410_v2  ;;  %v3298_v4 = vpop.f32.mrb[0].mxu1  ;;  %v3413_v49 = vpop.f32.mrb[34].mxu0  ;;  %v1015_v2 = vld [vmem:[#allocation2 + $0x118] sm:$0x1]  ;;  %v1329_v3 = vld [vmem:[#allocation2 + $0xf0] sm:$0xfe] }
 0x1cf   : > { %2822 = vmatprep.mubr.bf16.mxu0 %v4676_v61  ;;  %v3299_v6 = vpop.f32.mrb[1].mxu1  ;;  %v3414_v9 = vpop.f32.mrb[35].mxu0  ;;  %v1413_v22 = vrot.slane %v1329_v3, 1 }
 0x1d0   : > { %v3300_v62 = vadd.f32 %v3299_v6, %v3298_v4  ;;  %v3415_v13 = vadd.f32 %v3414_v9, %v3413_v49  ;;  %v3301_v5 = vpop.f32.mrb[2].mxu1  ;;  %v1251_v49 = vrot.slane %v1249_v57, 1 }
 0x1d1   : > { %v3302_v17 = vpop.f32.mrb[3].mxu1 }
 0x1d2   : > { %v2254_v18 = vadd.f32 %v3300_v62, %v4682_v8  ;;  %v3303_v20 = vadd.f32 %v3302_v17, %v3301_v5  ;;  %v1275_v5 = vrot.slane %v1273_v56, 1  ;;  %v1278_v17 = vshll.u32 %v1015_v2, 16 }
 0x1d3   : > { %2662 = vmatmul.mubr.bf16.gmra.mrb[108].mxu1 %v4545_v16  ;;  %v1244_v16 = vshll.u32 %v4499_v40, 16 }
 0x1d4   : > { %v2257_v27 = vadd.f32 %v3303_v20, %v4682_v8  ;;  %2669 = vmatprep.mubr.bf16.mxu1 %v4563_v36  ;;  %v4688_v32 = vadd.f32 %v3412_v50, %v2254_v18  ;;  %v1330_v50 = vld [vmem:[#allocation2 + $0xf8] sm:$0x1] }
 0x1d5   : > { %v1246_v55 = vrot.slane %v1244_v16, 1 }
 0x1d6   : > { %2823 = vmatmul.mubr.bf16.gmra.mrb[140].mxu0 %v4669_v53  ;;  %v3304_v28 = vpop.f32.mrb[4].mxu1  ;;  %v4694_v19 = vadd.f32 %v3415_v13, %v2257_v27  ;;  %v1271_v13 = vshrl.u32 %v4576_v43, 16  ;;  %v1414_v27 = vrot.slane %v1330_v50, 1 }
 0x1d7   : > { %2830 = vmatprep.mubr.bf16.mxu0 %v4692_v25  ;;  %v3305_v33 = vpop.f32.mrb[5].mxu1  ;;  %v1247_v4 = vor.u32 %v1246_v55, %v1242_v54 }
 0x1d8   : > { %v3306_v30 = vadd.f32 %v3305_v33, %v3304_v28  ;;  %v3307_v37 = vpop.f32.mrb[6].mxu1  ;;  %v1276_v43 = vor.u32 %v1275_v5, %v1271_v13 }
 0x1d9   : > { %v3416_v39 = vpop.f32.mrb[36].mxu0  ;;  %v3308_v63 = vpop.f32.mrb[7].mxu1  ;;  %v1252_v34 = vsel %vm1016_vm1, %v1247_v4, %v1251_v49 }
 0x1da   : > { %v3417_v46 = vpop.f32.mrb[37].mxu0  ;;  %v2262_v47 = vadd.f32 %v3306_v30, %v4682_v8  ;;  %v3309_v48 = vadd.f32 %v3308_v63, %v3307_v37  ;;  %v1280_v37 = vrot.slane %v1278_v17, 1 }
 0x1db   : > { %v3418_v51 = vadd.f32 %v3417_v46, %v3416_v39  ;;  %v3419_v10 = vpop.f32.mrb[38].mxu0  ;;  %2670 = vmatmul.mubr.bf16.gmra.mrb[112].mxu1 %v4554_v24  ;;  %v4722_v39 = vsel %vm1367_vm8, %v1413_v22, %v1414_v27  ;;  %v1331_v46 = vld [vmem:[#allocation2 + $0x100] sm:$0xfe] }
 0x1dc   : > { %v3420_v58 = vpop.f32.mrb[39].mxu0  ;;  %v2265_v59 = vadd.f32 %v3309_v48, %v4682_v8  ;;  %2677 = vmatprep.mubr.bf16.mxu1 %v4571_v60  ;;  %v1281_v54 = vsel %vm1016_vm1, %v1276_v43, %v1280_v37 }
 0x1dd   : > { %v3421_v42 = vadd.f32 %v3420_v58, %v3419_v10  ;;  %v4704_v0 = vadd.f32 %v3418_v51, %v2262_v47  ;;  %v1332_v47 = vld [vmem:[#allocation2 + $0x108] sm:$0x1] }
 0x1de   : > { %2831 = vmatmul.mubr.bf16.gmra.mrb[144].mxu0 %v4676_v61  ;;  %v3310_v24 = vpop.f32.mrb[8].mxu1 }
 0x1df   : > { %2838 = vmatprep.mubr.bf16.mxu0 %v4708_v1  ;;  %v3311_v40 = vpop.f32.mrb[9].mxu1  ;;  %v4711_v7 = vadd.f32 %v3421_v42, %v2265_v59  ;;  %v1450_v59 = vrot.slane %v1331_v46, 1  ;;  %v1451_v42 = vrot.slane %v1332_v47, 1 }
 0x1e0   : > { %v3312_v6 = vadd.f32 %v3311_v40, %v3310_v24  ;;  %v3313_v9 = vpop.f32.mrb[10].mxu1 }
 0x1e1   : > { %v3422_v12 = vpop.f32.mrb[40].mxu0  ;;  %v3314_v62 = vpop.f32.mrb[11].mxu1  ;;  %v4735_v4 = vsel %vm1367_vm8, %v1450_v59, %v1451_v42 }
 0x1e2   : > { %v3423_v18 = vpop.f32.mrb[41].mxu0  ;;  %v2270_v20 = vadd.f32 %v3312_v6, %v4682_v8  ;;  %v3315_v44 = vadd.f32 %v3314_v62, %v3313_v9 }
 0x1e3   : > { %v3424_v28 = vadd.f32 %v3423_v18, %v3422_v12  ;;  %v3425_v33 = vpop.f32.mrb[42].mxu0  ;;  %2678 = vmatmul.mubr.bf16.gmra.mrb[116].mxu1 %v4563_v36 }
 0x1e4   : > { %v3426_v35 = vpop.f32.mrb[43].mxu0  ;;  %v2273_v16 = vadd.f32 %v3315_v44, %v4682_v8  ;;  %2685 = vmatprep.mubr.bf16.mxu1 %v1252_v34 }
 0x1e5   : > { %v3427_v30 = vadd.f32 %v3426_v35, %v3425_v33  ;;  %v4718_v38 = vadd.f32 %v3424_v28, %v2270_v20 }
 0x1e6   : > { %2839 = vmatmul.mubr.bf16.gmra.mrb[148].mxu0 %v4692_v25  ;;  %v3316_v63 = vpop.f32.mrb[12].mxu1 }
 0x1e7   : > { %2846 = vmatprep.mubr.bf16.mxu0 %v4722_v39  ;;  %v3317_v36 = vpop.f32.mrb[13].mxu1  ;;  %v4725_v48 = vadd.f32 %v3427_v30, %v2273_v16 }
 0x1e8   : > { %v3318_v11 = vadd.f32 %v3317_v36, %v3316_v63  ;;  %v3319_v26 = vpop.f32.mrb[14].mxu1 }
 0x1e9   : > { %v3428_v51 = vpop.f32.mrb[44].mxu0  ;;  %v3320_v10 = vpop.f32.mrb[15].mxu1 }
 0x1ea   : > { %v3429_v55 = vpop.f32.mrb[45].mxu0  ;;  %v2278_v57 = vadd.f32 %v3318_v11, %v4682_v8  ;;  %v3321_v58 = vadd.f32 %v3320_v10, %v3319_v26 }
 0x1eb   : > { %v3430_v56 = vadd.f32 %v3429_v55, %v3428_v51  ;;  %v3431_v24 = vpop.f32.mrb[46].mxu0  ;;  %2686 = vmatmul.mubr.bf16.gmra.mrb[120].mxu1 %v4571_v60 }
 0x1ec   : > { %v3432_v2 = vpop.f32.mrb[47].mxu0  ;;  %v2281_v40 = vadd.f32 %v3321_v58, %v4682_v8  ;;  %2693 = vmatprep.mubr.bf16.mxu1 %v1281_v54 }
 0x1ed   : > { %v3433_v3 = vadd.f32 %v3432_v2, %v3431_v24  ;;  %v4731_v50 = vadd.f32 %v3430_v56, %v2278_v57 }
 0x1ee   : > { %2847 = vmatmul.mubr.bf16.gmra.mrb[152].mxu0 %v4708_v1  ;;  %v3322_v49 = vpop.f32.mrb[16].mxu1 }
 0x1ef   : > { %2854 = vmatprep.mubr.bf16.mxu0 %v4735_v4  ;;  %v3323_v6 = vpop.f32.mrb[17].mxu1  ;;  %v4738_v9 = vadd.f32 %v3433_v3, %v2281_v40 }
 0x1f0   : > { %v3324_v12 = vadd.f32 %v3323_v6, %v3322_v49  ;;  %v3325_v60 = vpop.f32.mrb[18].mxu1 }
 0x1f1   : > { %v3434_v62 = vpop.f32.mrb[48].mxu0  ;;  %v3326_v13 = vpop.f32.mrb[19].mxu1 }
 0x1f2   : > { %v3435_v5 = vpop.f32.mrb[49].mxu0  ;;  %v2286_v17 = vadd.f32 %v3324_v12, %v4682_v8  ;;  %v3327_v18 = vadd.f32 %v3326_v13, %v3325_v60 }
 0x1f3   : > { %v3436_v20 = vadd.f32 %v3435_v5, %v3434_v62  ;;  %v3437_v44 = vpop.f32.mrb[50].mxu0  ;;  %2694 = vmatmul.mubr.bf16.gmra.mrb[124].mxu1 %v1252_v34 }
 0x1f4   : > { %v3438_v22 = vpop.f32.mrb[51].mxu0  ;;  %v2289_v27 = vadd.f32 %v3327_v18, %v4682_v8  ;;  %3814 = vmatprep.mubr.bf16.mxu1 %v4614_v45 }
 0x1f5   : > { %v3439_v28 = vadd.f32 %v3438_v22, %v3437_v44  ;;  %v4743_v33 = vadd.f32 %v3436_v20, %v2286_v17 }
 0x1f6   : > { %2855 = vmatmul.mubr.bf16.gmra.mrb[156].mxu0 %v4722_v39  ;;  %v3328_v35 = vpop.f32.mrb[20].mxu1 }
 0x1f7   : > { %3810 = vmatprep.mubr.bf16.mxu0 %v4591_v41  ;;  %v3329_v16 = vpop.f32.mrb[21].mxu1  ;;  %v4747_v30 = vadd.f32 %v3439_v28, %v2289_v27 }
 0x1f8   : > { %v3330_v43 = vadd.f32 %v3329_v16, %v3328_v35  ;;  %v3331_v37 = vpop.f32.mrb[22].mxu1 }
 0x1f9   : > { %v3440_v63 = vpop.f32.mrb[52].mxu0  ;;  %v3332_v34 = vpop.f32.mrb[23].mxu1 }
 0x1fa   : > { %v3441_v36 = vpop.f32.mrb[53].mxu0  ;;  %v2294_v46 = vadd.f32 %v3330_v43, %v4682_v8  ;;  %v3333_v47 = vadd.f32 %v3332_v34, %v3331_v37 }
 0x1fb   : > { %v3442_v45 = vadd.f32 %v3441_v36, %v3440_v63  ;;  %v3443_v11 = vpop.f32.mrb[54].mxu0  ;;  %3815 = vmatmul.mubr.bf16.vlgmr.msra.gmra.mrb[128].mxu1 %v4627_v23 }
 0x1fc   : > { %v3444_v26 = vpop.f32.mrb[55].mxu0  ;;  %v2297_v51 = vadd.f32 %v3333_v47, %v4682_v8  ;;  %3818 = vmatprep.mubr.bf16.mxu1 %v4634_v29 }
 0x1fd   : > { %v3445_v41 = vadd.f32 %v3444_v26, %v3443_v11  ;;  %v4753_v10 = vadd.f32 %v3442_v45, %v2294_v46 }
 0x1fe   : > { %3811 = vmatmul.mubr.bf16.vlgmr.msra.gmra.mrb[160].mxu0 %v4601_v31  ;;  %v3334_v54 = vpop.f32.mrb[24].mxu1 }
 0x1ff   : > { %v3335_v55 = vpop.f32.mrb[25].mxu1  ;;  %v4756_v57 = vadd.f32 %v3445_v41, %v2297_v51 }
 0x200   : > { %v3336_v58 = vadd.f32 %v3335_v55, %v3334_v54  ;;  %v3337_v59 = vpop.f32.mrb[26].mxu1 }
 0x201   : > { %v3446_v42 = vpop.f32.mrb[56].mxu0  ;;  %v3338_v56 = vpop.f32.mrb[27].mxu1 }
 0x202   : > { %v3447_v24 = vpop.f32.mrb[57].mxu0  ;;  %v2302_v23 = vadd.f32 %v3336_v58, %v4682_v8  ;;  %v3339_v2 = vadd.f32 %v3338_v56, %v3337_v59 }
 0x203   : > { %v3448_v40 = vadd.f32 %v3447_v24, %v3446_v42  ;;  %v3449_v3 = vpop.f32.mrb[58].mxu0  ;;  %3819 = vmatmul.mubr.bf16.gmra.mrb[132].mxu1 %v4641_v21 }
 0x204   : > { %v3450_v29 = vpop.f32.mrb[59].mxu0  ;;  %v2305_v49 = vadd.f32 %v3339_v2, %v4682_v8  ;;  %3822 = vmatprep.mubr.bf16.mxu1 %v4648_v52 }
 0x205   : > { %v3451_v31 = vadd.f32 %v3450_v29, %v3449_v3  ;;  %v4762_v6 = vadd.f32 %v3448_v40, %v2302_v23 }
 0x206   : > { %v3340_v12 = vpop.f32.mrb[28].mxu1 }
 0x207   : > { %v3341_v60 = vpop.f32.mrb[29].mxu1  ;;  %v4764_v62 = vadd.f32 %v3451_v31, %v2305_v49 }
 0x208   : > { %v3342_v13 = vadd.f32 %v3341_v60, %v3340_v12  ;;  %v3343_v5 = vpop.f32.mrb[30].mxu1 }
 0x209   : > { %v3452_v17 = vpop.f32.mrb[60].mxu0  ;;  %v3344_v18 = vpop.f32.mrb[31].mxu1 }
 0x20a   : > { %v3453_v20 = vpop.f32.mrb[61].mxu0  ;;  %v2310_v44 = vadd.f32 %v3342_v13, %v4682_v8  ;;  %v3345_v21 = vadd.f32 %v3344_v18, %v3343_v5 }
 0x20b   : > { %v3454_v22 = vadd.f32 %v3453_v20, %v3452_v17  ;;  %v3455_v27 = vpop.f32.mrb[62].mxu0  ;;  %3823 = vmatmul.mubr.bf16.gmra.mrb[136].mxu1 %v4655_v14 }
 0x20c   : > { %v3456_v52 = vpop.f32.mrb[63].mxu0  ;;  %v2313_v28 = vadd.f32 %v3345_v21, %v4682_v8  ;;  %3826 = vmatprep.mubr.bf16.mxu1 %v4662_v15 }
 0x20d   : > { %v3457_v35 = vadd.f32 %v3456_v52, %v3455_v27  ;;  %v4770_v16 = vadd.f32 %v3454_v22, %v2310_v44  ;;  %v1333_v22 = vld [vmem:[#allocation2 + $0x110] sm:$0xfe]  ;;  %v1334_v27 = vld [vmem:[#allocation2 + $0x118] sm:$0x1] }
 0x20e   : > { %v3346_v43 = vpop.f32.mrb[32].mxu1 }
 0x20f   : > { %v3347_v37 = vpop.f32.mrb[33].mxu1  ;;  %v4772_v63 = vadd.f32 %v3457_v35, %v2313_v28 }
 0x210   : > { %v3348_v34 = vadd.f32 %v3347_v37, %v3346_v43  ;;  %v3349_v36 = vpop.f32.mrb[34].mxu1 }
 0x211   : > { %v3458_v46 = vpop.f32.mrb[64].mxu0  ;;  %v3350_v47 = vpop.f32.mrb[35].mxu1 }
 0x212   : > { %v3459_v45 = vpop.f32.mrb[65].mxu0  ;;  %v2318_v11 = vadd.f32 %v3348_v34, %v4682_v8  ;;  %v3351_v14 = vadd.f32 %v3350_v47, %v3349_v36  ;;  %v1472_v34 = vrot.slane %v1333_v22, 1  ;;  %v1473_v36 = vrot.slane %v1334_v27, 1 }
 0x213   : > { %v3460_v26 = vadd.f32 %v3459_v45, %v3458_v46  ;;  %v3461_v51 = vpop.f32.mrb[66].mxu0  ;;  %3827 = vmatmul.mubr.bf16.gmra.mrb[140].mxu1 %v4669_v53 }
 0x214   : > { %v3462_v15 = vpop.f32.mrb[67].mxu0  ;;  %v2321_v41 = vadd.f32 %v3351_v14, %v4682_v8  ;;  %3830 = vmatprep.mubr.bf16.mxu1 %v4676_v61 }
 0x215   : > { %v3463_v54 = vadd.f32 %v3462_v15, %v3461_v51  ;;  %v4778_v55 = vadd.f32 %v3460_v26, %v2318_v11  ;;  %v1474_v15 = vsel %vm1367_vm8, %v1472_v34, %v1473_v36 }
 0x216   : > { %v3352_v58 = vpop.f32.mrb[36].mxu1 }
 0x217   : > { %v3353_v59 = vpop.f32.mrb[37].mxu1  ;;  %v4780_v42 = vadd.f32 %v3463_v54, %v2321_v41 }
 0x218   : > { %v3354_v56 = vadd.f32 %v3353_v59, %v3352_v58  ;;  %v3355_v24 = vpop.f32.mrb[38].mxu1 }
 0x219   : > { %v3464_v23 = vpop.f32.mrb[68].mxu0  ;;  %v3356_v2 = vpop.f32.mrb[39].mxu1 }
 0x21a   : > { %v3465_v40 = vpop.f32.mrb[69].mxu0  ;;  %v2326_v3 = vadd.f32 %v3354_v56, %v4682_v8  ;;  %v3357_v53 = vadd.f32 %v3356_v2, %v3355_v24 }
 0x21b   : > { %v3466_v29 = vadd.f32 %v3465_v40, %v3464_v23  ;;  %v3467_v49 = vpop.f32.mrb[70].mxu0  ;;  %3831 = vmatmul.mubr.bf16.gmra.mrb[144].mxu1 %v4692_v25 }
 0x21c   : > { %v3468_v61 = vpop.f32.mrb[71].mxu0  ;;  %v2329_v31 = vadd.f32 %v3357_v53, %v4682_v8  ;;  %3834 = vmatprep.mubr.bf16.mxu1 %v4708_v1 }
 0x21d   : > { %v3469_v12 = vadd.f32 %v3468_v61, %v3467_v49  ;;  %v4786_v60 = vadd.f32 %v3466_v29, %v2326_v3 }
 0x21e   : > { %v3358_v13 = vpop.f32.mrb[40].mxu1 }
 0x21f   : > { %v3359_v5 = vpop.f32.mrb[41].mxu1  ;;  %v4788_v17 = vadd.f32 %v3469_v12, %v2329_v31 }
 0x220   : > { %v3360_v18 = vadd.f32 %v3359_v5, %v3358_v13  ;;  %v3361_v20 = vpop.f32.mrb[42].mxu1 }
 0x221   : > { %v3470_v44 = vpop.f32.mrb[72].mxu0  ;;  %v3362_v21 = vpop.f32.mrb[43].mxu1 }
 0x222   : > { %v3471_v52 = vpop.f32.mrb[73].mxu0  ;;  %v2334_v25 = vadd.f32 %v3360_v18, %v4682_v8  ;;  %v3363_v28 = vadd.f32 %v3362_v21, %v3361_v20 }
 0x223   : > { %v3472_v35 = vadd.f32 %v3471_v52, %v3470_v44  ;;  %v3473_v43 = vpop.f32.mrb[74].mxu0  ;;  %3835 = vmatmul.mubr.bf16.gmra.mrb[148].mxu1 %v4722_v39 }
 0x224   : > { %v3474_v1 = vpop.f32.mrb[75].mxu0  ;;  %v2337_v37 = vadd.f32 %v3363_v28, %v4682_v8  ;;  %3838 = vmatprep.mubr.bf16.mxu1 %v4735_v4 }
 0x225   : > { %v3475_v46 = vadd.f32 %v3474_v1, %v3473_v43  ;;  %v4794_v47 = vadd.f32 %v3472_v35, %v2334_v25 }
 0x226   : > { %v3364_v45 = vpop.f32.mrb[44].mxu1 }
 0x227   : > { %v3365_v11 = vpop.f32.mrb[45].mxu1  ;;  %v4796_v14 = vadd.f32 %v3475_v46, %v2337_v37 }
 0x228   : > { %v3366_v26 = vadd.f32 %v3365_v11, %v3364_v45  ;;  %v3367_v51 = vpop.f32.mrb[46].mxu1 }
 0x229   : > { %v3476_v41 = vpop.f32.mrb[76].mxu0  ;;  %v3368_v39 = vpop.f32.mrb[47].mxu1 }
 0x22a   : > { %v3477_v54 = vpop.f32.mrb[77].mxu0  ;;  %v2342_v58 = vadd.f32 %v3366_v26, %v4682_v8  ;;  %v3369_v59 = vadd.f32 %v3368_v39, %v3367_v51 }
 0x22b   : > { %v3478_v4 = vadd.f32 %v3477_v54, %v3476_v41  ;;  %v3479_v56 = vpop.f32.mrb[78].mxu0  ;;  %3839 = vmatmul.mubr.bf16.gmra.mrb[152].mxu1 %v1474_v15 }
 0x22c   : > { %v3480_v24 = vpop.f32.mrb[79].mxu0  ;;  %v2345_v23 = vadd.f32 %v3369_v59, %v4682_v8 }
 0x22d   : > { %v3481_v2 = vadd.f32 %v3480_v24, %v3479_v56  ;;  %v4801_v40 = vadd.f32 %v3478_v4, %v2342_v58 }
 0x22e   : > { %v3370_v3 = vpop.f32.mrb[48].mxu1 }
 0x22f   : > { %v3371_v53 = vpop.f32.mrb[49].mxu1  ;;  %v4803_v29 = vadd.f32 %v3481_v2, %v2345_v23 }
 0x230   : > { %v3372_v49 = vadd.f32 %v3371_v53, %v3370_v3  ;;  %v3373_v61 = vpop.f32.mrb[50].mxu1 }
 0x231   : > { %v3482_v31 = vpop.f32.mrb[80].mxu0  ;;  %v3374_v12 = vpop.f32.mrb[51].mxu1 }
 0x232   : > { %v3483_v13 = vpop.f32.mrb[81].mxu0  ;;  %v2350_v5 = vadd.f32 %v3372_v49, %v4682_v8  ;;  %v3375_v18 = vadd.f32 %v3374_v12, %v3373_v61 }
 0x233   : > { %v3484_v20 = vadd.f32 %v3483_v13, %v3482_v31  ;;  %v3485_v44 = vpop.f32.mrb[82].mxu0 }
 0x234   : > { %v3486_v21 = vpop.f32.mrb[83].mxu0  ;;  %v2353_v22 = vadd.f32 %v3375_v18, %v4682_v8 }
 0x235   : > { %v3487_v27 = vadd.f32 %v3486_v21, %v3485_v44  ;;  %v4807_v52 = vadd.f32 %v3484_v20, %v2350_v5 }
 0x236   : > { %v3376_v25 = vpop.f32.mrb[52].mxu1 }
 0x237   : > { %v3377_v28 = vpop.f32.mrb[53].mxu1  ;;  %v4809_v35 = vadd.f32 %v3487_v27, %v2353_v22 }
 0x238   : > { %v3378_v43 = vadd.f32 %v3377_v28, %v3376_v25  ;;  %v3379_v1 = vpop.f32.mrb[54].mxu1 }
 0x239   : > { %v3488_v37 = vpop.f32.mrb[84].mxu0  ;;  %v3380_v34 = vpop.f32.mrb[55].mxu1 }
 0x23a   : > { %v3489_v36 = vpop.f32.mrb[85].mxu0  ;;  %v2358_v46 = vadd.f32 %v3378_v43, %v4682_v8  ;;  %v3381_v45 = vadd.f32 %v3380_v34, %v3379_v1 }
 0x23b   : > { %v3490_v11 = vadd.f32 %v3489_v36, %v3488_v37  ;;  %v3491_v26 = vpop.f32.mrb[86].mxu0 }
 0x23c   : > { %v3492_v51 = vpop.f32.mrb[87].mxu0  ;;  %v2361_v15 = vadd.f32 %v3381_v45, %v4682_v8 }
 0x23d   : > { %v3493_v41 = vadd.f32 %v3492_v51, %v3491_v26  ;;  %v4813_v39 = vadd.f32 %v3490_v11, %v2358_v46 }
 0x23e   : > { %v3382_v54 = vpop.f32.mrb[56].mxu1 }
 0x23f   : > { %v3383_v58 = vpop.f32.mrb[57].mxu1  ;;  %v4815_v59 = vadd.f32 %v3493_v41, %v2361_v15 }
 0x240   : > { %v3384_v4 = vadd.f32 %v3383_v58, %v3382_v54  ;;  %v3385_v56 = vpop.f32.mrb[58].mxu1 }
 0x241   : > { %v3494_v24 = vpop.f32.mrb[88].mxu0  ;;  %v3386_v23 = vpop.f32.mrb[59].mxu1 }
 0x242   : > { %v3495_v2 = vpop.f32.mrb[89].mxu0  ;;  %v2366_v3 = vadd.f32 %v3384_v4, %v4682_v8  ;;  %v3387_v53 = vadd.f32 %v3386_v23, %v3385_v56 }
 0x243   : > { %v3496_v49 = vadd.f32 %v3495_v2, %v3494_v24  ;;  %v3497_v61 = vpop.f32.mrb[90].mxu0 }
 0x244   : > { %v3498_v31 = vpop.f32.mrb[91].mxu0  ;;  %v2369_v12 = vadd.f32 %v3387_v53, %v4682_v8 }
 0x245   : > { %v3499_v13 = vadd.f32 %v3498_v31, %v3497_v61  ;;  %v4819_v5 = vadd.f32 %v3496_v49, %v2366_v3 }
 0x246   : > { %v3388_v18 = vpop.f32.mrb[60].mxu1 }
 0x247   : > { %v3389_v20 = vpop.f32.mrb[61].mxu1  ;;  %v4821_v44 = vadd.f32 %v3499_v13, %v2369_v12 }
 0x248   : > { %v3390_v21 = vadd.f32 %v3389_v20, %v3388_v18  ;;  %v3391_v22 = vpop.f32.mrb[62].mxu1 }
 0x249   : > { %v3500_v27 = vpop.f32.mrb[92].mxu0  ;;  %v3392_v25 = vpop.f32.mrb[63].mxu1 }
 0x24a   : > { %v3501_v28 = vpop.f32.mrb[93].mxu0  ;;  %v2374_v43 = vadd.f32 %v3390_v21, %v4682_v8  ;;  %v3393_v1 = vadd.f32 %v3392_v25, %v3391_v22 }
 0x24b   : > { %v3502_v37 = vadd.f32 %v3501_v28, %v3500_v27  ;;  %v3503_v34 = vpop.f32.mrb[94].mxu0 }
 0x24c   : > { %v3504_v36 = vpop.f32.mrb[95].mxu0  ;;  %v2377_v46 = vadd.f32 %v3393_v1, %v4682_v8 }
 0x24d   : > { %v3505_v45 = vadd.f32 %v3504_v36, %v3503_v34  ;;  %v4825_v11 = vadd.f32 %v3502_v37, %v2374_v43 }
 0x24e   : > { %v3522_v26 = vpop.f32.mrb[64].mxu1 }
 0x24f   : > { %v3523_v51 = vpop.f32.mrb[65].mxu1  ;;  %v4827_v15 = vadd.f32 %v3505_v45, %v2377_v46 }
 0x250   : > { %v3524_v41 = vadd.f32 %v3523_v51, %v3522_v26  ;;  %v3525_v54 = vpop.f32.mrb[66].mxu1 }
 0x251   : > { %v3634_v58 = vpop.f32.mrb[96].mxu0  ;;  %v3526_v4 = vpop.f32.mrb[67].mxu1 }
 0x252   : > { %v3635_v56 = vpop.f32.mrb[97].mxu0  ;;  %v2576_v24 = vadd.f32 %v3524_v41, %v4688_v32  ;;  %v3527_v23 = vadd.f32 %v3526_v4, %v3525_v54 }
 0x253   : > { %v3636_v2 = vadd.f32 %v3635_v56, %v3634_v58  ;;  %v3637_v3 = vpop.f32.mrb[98].mxu0 }
 0x254   : > { %v3638_v53 = vpop.f32.mrb[99].mxu0  ;;  %v2579_v8 = vadd.f32 %v3527_v23, %v4694_v19 }
 0x255   : > { %v3639_v49 = vadd.f32 %v3638_v53, %v3637_v3  ;;  %v4831_v61 = vadd.f32 %v3636_v2, %v2576_v24 }
 0x256   : > { %v3528_v31 = vpop.f32.mrb[68].mxu1 }
 0x257   : > { %v3529_v12 = vpop.f32.mrb[69].mxu1  ;;  %v4833_v13 = vadd.f32 %v3639_v49, %v2579_v8 }
 0x258   : > { %v3530_v18 = vadd.f32 %v3529_v12, %v3528_v31  ;;  %v3531_v20 = vpop.f32.mrb[70].mxu1 }
 0x259   : > { %v3640_v21 = vpop.f32.mrb[100].mxu0  ;;  %v3532_v22 = vpop.f32.mrb[71].mxu1 }
 0x25a   : > { %v3641_v27 = vpop.f32.mrb[101].mxu0  ;;  %v2584_v32 = vadd.f32 %v3530_v18, %v4704_v0  ;;  %v3533_v25 = vadd.f32 %v3532_v22, %v3531_v20 }
 0x25b   : > { %v3642_v28 = vadd.f32 %v3641_v27, %v3640_v21  ;;  %v3643_v43 = vpop.f32.mrb[102].mxu0 }
 0x25c   : > { %v3644_v1 = vpop.f32.mrb[103].mxu0  ;;  %v2587_v19 = vadd.f32 %v3533_v25, %v4711_v7 }
 0x25d   : > { %v3645_v37 = vadd.f32 %v3644_v1, %v3643_v43  ;;  %v4837_v34 = vadd.f32 %v3642_v28, %v2584_v32 }
 0x25e   : > { %v3534_v36 = vpop.f32.mrb[72].mxu1 }
 0x25f   : > { %v3535_v46 = vpop.f32.mrb[73].mxu1  ;;  %v4839_v45 = vadd.f32 %v3645_v37, %v2587_v19 }
 0x260   : > { %v3536_v26 = vadd.f32 %v3535_v46, %v3534_v36  ;;  %v3537_v51 = vpop.f32.mrb[74].mxu1 }
 0x261   : > { %v3646_v41 = vpop.f32.mrb[104].mxu0  ;;  %v3538_v54 = vpop.f32.mrb[75].mxu1 }
 0x262   : > { %v3647_v58 = vpop.f32.mrb[105].mxu0  ;;  %v2592_v0 = vadd.f32 %v3536_v26, %v4718_v38  ;;  %v3539_v4 = vadd.f32 %v3538_v54, %v3537_v51 }
 0x263   : > { %v3648_v56 = vadd.f32 %v3647_v58, %v3646_v41  ;;  %v3649_v24 = vpop.f32.mrb[106].mxu0 }
 0x264   : > { %v3650_v23 = vpop.f32.mrb[107].mxu0  ;;  %v2595_v7 = vadd.f32 %v3539_v4, %v4725_v48 }
 0x265   : > { %v3651_v2 = vadd.f32 %v3650_v23, %v3649_v24  ;;  %v4843_v3 = vadd.f32 %v3648_v56, %v2592_v0 }
 0x266   : > { %v3540_v53 = vpop.f32.mrb[76].mxu1 }
 0x267   : > { %v3541_v8 = vpop.f32.mrb[77].mxu1  ;;  %v4845_v49 = vadd.f32 %v3651_v2, %v2595_v7 }
 0x268   : > { %v3542_v31 = vadd.f32 %v3541_v8, %v3540_v53  ;;  %v3543_v12 = vpop.f32.mrb[78].mxu1 }
 0x269   : > { %v3652_v18 = vpop.f32.mrb[108].mxu0  ;;  %v3544_v20 = vpop.f32.mrb[79].mxu1 }
 0x26a   : > { %v3653_v21 = vpop.f32.mrb[109].mxu0  ;;  %v2600_v38 = vadd.f32 %v3542_v31, %v4731_v50  ;;  %v3545_v22 = vadd.f32 %v3544_v20, %v3543_v12 }
 0x26b   : > { %v3654_v27 = vadd.f32 %v3653_v21, %v3652_v18  ;;  %v3655_v32 = vpop.f32.mrb[110].mxu0 }
 0x26c   : > { %v3656_v25 = vpop.f32.mrb[111].mxu0  ;;  %v2603_v48 = vadd.f32 %v3545_v22, %v4738_v9 }
 0x26d   : > { %v3657_v28 = vadd.f32 %v3656_v25, %v3655_v32  ;;  %v4849_v43 = vadd.f32 %v3654_v27, %v2600_v38 }
 0x26e   : > { %v3546_v1 = vpop.f32.mrb[80].mxu1 }
 0x26f   : > { %v3547_v19 = vpop.f32.mrb[81].mxu1  ;;  %v4851_v37 = vadd.f32 %v3657_v28, %v2603_v48 }
 0x270   : > { %v3548_v36 = vadd.f32 %v3547_v19, %v3546_v1  ;;  %v3549_v46 = vpop.f32.mrb[82].mxu1 }
 0x271   : > { %v3658_v26 = vpop.f32.mrb[112].mxu0  ;;  %v3550_v51 = vpop.f32.mrb[83].mxu1 }
 0x272   : > { %v3659_v41 = vpop.f32.mrb[113].mxu0  ;;  %v2608_v50 = vadd.f32 %v3548_v36, %v4743_v33  ;;  %v3551_v54 = vadd.f32 %v3550_v51, %v3549_v46 }
 0x273   : > { %v3660_v58 = vadd.f32 %v3659_v41, %v3658_v26  ;;  %v3661_v0 = vpop.f32.mrb[114].mxu0 }
 0x274   : > { %v3662_v4 = vpop.f32.mrb[115].mxu0  ;;  %v2611_v9 = vadd.f32 %v3551_v54, %v4747_v30 }
 0x275   : > { %v3663_v56 = vadd.f32 %v3662_v4, %v3661_v0  ;;  %v4855_v24 = vadd.f32 %v3660_v58, %v2608_v50 }
 0x276   : > { %v3552_v23 = vpop.f32.mrb[84].mxu1 }
 0x277   : > { %v3553_v7 = vpop.f32.mrb[85].mxu1  ;;  %v4857_v2 = vadd.f32 %v3663_v56, %v2611_v9 }
 0x278   : > { %v3554_v53 = vadd.f32 %v3553_v7, %v3552_v23  ;;  %v3555_v8 = vpop.f32.mrb[86].mxu1 }
 0x279   : > { %v3664_v31 = vpop.f32.mrb[116].mxu0  ;;  %v3556_v12 = vpop.f32.mrb[87].mxu1 }
 0x27a   : > { %v3665_v18 = vpop.f32.mrb[117].mxu0  ;;  %v2616_v33 = vadd.f32 %v3554_v53, %v4753_v10  ;;  %v3557_v20 = vadd.f32 %v3556_v12, %v3555_v8 }
 0x27b   : > { %v3666_v21 = vadd.f32 %v3665_v18, %v3664_v31  ;;  %v3667_v38 = vpop.f32.mrb[118].mxu0 }
 0x27c   : > { %v3668_v22 = vpop.f32.mrb[119].mxu0  ;;  %v2619_v30 = vadd.f32 %v3557_v20, %v4756_v57 }
 0x27d   : > { %v3669_v27 = vadd.f32 %v3668_v22, %v3667_v38  ;;  %v4861_v32 = vadd.f32 %v3666_v21, %v2616_v33 }
 0x27e   : > { %v3558_v25 = vpop.f32.mrb[88].mxu1 }
 0x27f   : > { %v3559_v48 = vpop.f32.mrb[89].mxu1  ;;  %v4863_v28 = vadd.f32 %v3669_v27, %v2619_v30 }
 0x280   : > { %v3560_v1 = vadd.f32 %v3559_v48, %v3558_v25  ;;  %v3561_v19 = vpop.f32.mrb[90].mxu1 }
 0x281   : > { %v3670_v36 = vpop.f32.mrb[120].mxu0  ;;  %v3562_v46 = vpop.f32.mrb[91].mxu1 }
 0x282   : > { %v3671_v26 = vpop.f32.mrb[121].mxu0  ;;  %v2624_v10 = vadd.f32 %v3560_v1, %v4762_v6  ;;  %v3563_v51 = vadd.f32 %v3562_v46, %v3561_v19 }
 0x283   : > { %v3672_v41 = vadd.f32 %v3671_v26, %v3670_v36  ;;  %v3673_v50 = vpop.f32.mrb[122].mxu0 }
 0x284   : > { %v3674_v54 = vpop.f32.mrb[123].mxu0  ;;  %v2627_v57 = vadd.f32 %v3563_v51, %v4764_v62 }
 0x285   : > { %v3675_v58 = vadd.f32 %v3674_v54, %v3673_v50  ;;  %v4867_v0 = vadd.f32 %v3672_v41, %v2624_v10 }
 0x286   : > { %v3564_v4 = vpop.f32.mrb[92].mxu1 }
 0x287   : > { %v3565_v9 = vpop.f32.mrb[93].mxu1  ;;  %v4869_v56 = vadd.f32 %v3675_v58, %v2627_v57 }
 0x288   : > { %v3566_v23 = vadd.f32 %v3565_v9, %v3564_v4  ;;  %v3567_v7 = vpop.f32.mrb[94].mxu1 }
 0x289   : > { %v3676_v53 = vpop.f32.mrb[124].mxu0  ;;  %v3568_v8 = vpop.f32.mrb[95].mxu1 }
 0x28a   : > { %v3677_v31 = vpop.f32.mrb[125].mxu0  ;;  %v2632_v6 = vadd.f32 %v3566_v23, %v4770_v16  ;;  %v3569_v12 = vadd.f32 %v3568_v8, %v3567_v7 }
 0x28b   : > { %v3678_v18 = vadd.f32 %v3677_v31, %v3676_v53  ;;  %v3679_v33 = vpop.f32.mrb[126].mxu0 }
 0x28c   : > { %v3680_v20 = vpop.f32.mrb[127].mxu0  ;;  %v2635_v62 = vadd.f32 %v3569_v12, %v4772_v63 }
 0x28d   : > { %v3681_v21 = vadd.f32 %v3680_v20, %v3679_v33  ;;  %v4873_v38 = vadd.f32 %v3678_v18, %v2632_v6 }
 0x28e   : > { %v3570_v22 = vpop.f32.mrb[96].mxu1 }
 0x28f   : > { %v3571_v30 = vpop.f32.mrb[97].mxu1  ;;  %v4875_v27 = vadd.f32 %v3681_v21, %v2635_v62 }
 0x290   : > { %v3572_v25 = vadd.f32 %v3571_v30, %v3570_v22  ;;  %v3573_v48 = vpop.f32.mrb[98].mxu1 }
 0x291   : > { %v3682_v1 = vpop.f32.mrb[128].mxu0  ;;  %v3574_v19 = vpop.f32.mrb[99].mxu1 }
 0x292   : > { %v3683_v36 = vpop.f32.mrb[129].mxu0  ;;  %v2640_v16 = vadd.f32 %v3572_v25, %v4778_v55  ;;  %v3575_v46 = vadd.f32 %v3574_v19, %v3573_v48 }
 0x293   : > { %v3684_v26 = vadd.f32 %v3683_v36, %v3682_v1  ;;  %v3685_v10 = vpop.f32.mrb[130].mxu0 }
 0x294   : > { %v3686_v51 = vpop.f32.mrb[131].mxu0  ;;  %v2643_v63 = vadd.f32 %v3575_v46, %v4780_v42 }
 0x295   : > { %v3687_v41 = vadd.f32 %v3686_v51, %v3685_v10  ;;  %v4879_v50 = vadd.f32 %v3684_v26, %v2640_v16 }
 0x296   : > { %v3576_v54 = vpop.f32.mrb[100].mxu1 }
 0x297   : > { %v3577_v57 = vpop.f32.mrb[101].mxu1  ;;  %v4881_v58 = vadd.f32 %v3687_v41, %v2643_v63 }
 0x298   : > { %v3578_v4 = vadd.f32 %v3577_v57, %v3576_v54  ;;  %v3579_v9 = vpop.f32.mrb[102].mxu1 }
 0x299   : > { %v3688_v23 = vpop.f32.mrb[132].mxu0  ;;  %v3580_v7 = vpop.f32.mrb[103].mxu1 }
 0x29a   : > { %v3689_v53 = vpop.f32.mrb[133].mxu0  ;;  %v2648_v55 = vadd.f32 %v3578_v4, %v4786_v60  ;;  %v3581_v8 = vadd.f32 %v3580_v7, %v3579_v9 }
 0x29b   : > { %v3690_v31 = vadd.f32 %v3689_v53, %v3688_v23  ;;  %v3691_v6 = vpop.f32.mrb[134].mxu0 }
 0x29c   : > { %v3692_v12 = vpop.f32.mrb[135].mxu0  ;;  %v2651_v42 = vadd.f32 %v3581_v8, %v4788_v17 }
 0x29d   : > { %v3693_v18 = vadd.f32 %v3692_v12, %v3691_v6  ;;  %v4885_v33 = vadd.f32 %v3690_v31, %v2648_v55 }
 0x29e   : > { %v3582_v20 = vpop.f32.mrb[104].mxu1 }
 0x29f   : > { %v3583_v62 = vpop.f32.mrb[105].mxu1  ;;  %v4887_v21 = vadd.f32 %v3693_v18, %v2651_v42 }
 0x2a0   : > { %v3584_v22 = vadd.f32 %v3583_v62, %v3582_v20  ;;  %v3585_v30 = vpop.f32.mrb[106].mxu1 }
 0x2a1   : > { %v3694_v25 = vpop.f32.mrb[136].mxu0  ;;  %v3586_v48 = vpop.f32.mrb[107].mxu1 }
 0x2a2   : > { %v3695_v1 = vpop.f32.mrb[137].mxu0  ;;  %v2656_v60 = vadd.f32 %v3584_v22, %v4794_v47  ;;  %v3587_v19 = vadd.f32 %v3586_v48, %v3585_v30 }
 0x2a3   : > { %v3696_v36 = vadd.f32 %v3695_v1, %v3694_v25  ;;  %v3697_v16 = vpop.f32.mrb[138].mxu0 }
 0x2a4   : > { %v3698_v46 = vpop.f32.mrb[139].mxu0  ;;  %v2659_v17 = vadd.f32 %v3587_v19, %v4796_v14 }
 0x2a5   : > { %v3699_v26 = vadd.f32 %v3698_v46, %v3697_v16  ;;  %v4891_v10 = vadd.f32 %v3696_v36, %v2656_v60 }
 0x2a6   : > { %v3588_v51 = vpop.f32.mrb[108].mxu1 }
 0x2a7   : > { %v3589_v63 = vpop.f32.mrb[109].mxu1  ;;  %v4893_v41 = vadd.f32 %v3699_v26, %v2659_v17 }
 0x2a8   : > { %v3590_v54 = vadd.f32 %v3589_v63, %v3588_v51  ;;  %v3591_v57 = vpop.f32.mrb[110].mxu1 }
 0x2a9   : > { %v3700_v4 = vpop.f32.mrb[140].mxu0  ;;  %v3592_v9 = vpop.f32.mrb[111].mxu1 }
 0x2aa   : > { %v3701_v23 = vpop.f32.mrb[141].mxu0  ;;  %v2664_v47 = vadd.f32 %v3590_v54, %v4801_v40  ;;  %v3593_v7 = vadd.f32 %v3592_v9, %v3591_v57 }
 0x2ab   : > { %v3702_v53 = vadd.f32 %v3701_v23, %v3700_v4  ;;  %v3703_v55 = vpop.f32.mrb[142].mxu0 }
 0x2ac   : > { %v3704_v8 = vpop.f32.mrb[143].mxu0  ;;  %v2667_v14 = vadd.f32 %v3593_v7, %v4803_v29 }
 0x2ad   : > { %v3705_v31 = vadd.f32 %v3704_v8, %v3703_v55  ;;  %v4897_v6 = vadd.f32 %v3702_v53, %v2664_v47 }
 0x2ae   : > { %v3594_v12 = vpop.f32.mrb[112].mxu1 }
 0x2af   : > { %v3595_v42 = vpop.f32.mrb[113].mxu1  ;;  %v4899_v18 = vadd.f32 %v3705_v31, %v2667_v14 }
 0x2b0   : > { %v3596_v20 = vadd.f32 %v3595_v42, %v3594_v12  ;;  %v3597_v62 = vpop.f32.mrb[114].mxu1 }
 0x2b1   : > { %v3706_v22 = vpop.f32.mrb[144].mxu0  ;;  %v3598_v30 = vpop.f32.mrb[115].mxu1 }
 0x2b2   : > { %v3707_v25 = vpop.f32.mrb[145].mxu0  ;;  %v2672_v40 = vadd.f32 %v3596_v20, %v4807_v52  ;;  %v3599_v48 = vadd.f32 %v3598_v30, %v3597_v62 }
 0x2b3   : > { %v3708_v1 = vadd.f32 %v3707_v25, %v3706_v22  ;;  %v3709_v60 = vpop.f32.mrb[146].mxu0 }
 0x2b4   : > { %v3710_v19 = vpop.f32.mrb[147].mxu0  ;;  %v2675_v29 = vadd.f32 %v3599_v48, %v4809_v35 }
 0x2b5   : > { %v3711_v36 = vadd.f32 %v3710_v19, %v3709_v60  ;;  %v4903_v16 = vadd.f32 %v3708_v1, %v2672_v40 }
 0x2b6   : > { %v3600_v46 = vpop.f32.mrb[116].mxu1 }
 0x2b7   : > { %v3601_v17 = vpop.f32.mrb[117].mxu1  ;;  %v4905_v26 = vadd.f32 %v3711_v36, %v2675_v29 }
 0x2b8   : > { %v3602_v51 = vadd.f32 %v3601_v17, %v3600_v46  ;;  %v3603_v63 = vpop.f32.mrb[118].mxu1 }
 0x2b9   : > { %v3712_v54 = vpop.f32.mrb[148].mxu0  ;;  %v3604_v57 = vpop.f32.mrb[119].mxu1 }
 0x2ba   : > { %v3713_v4 = vpop.f32.mrb[149].mxu0  ;;  %v2680_v52 = vadd.f32 %v3602_v51, %v4813_v39  ;;  %v3605_v9 = vadd.f32 %v3604_v57, %v3603_v63 }
 0x2bb   : > { %v3714_v23 = vadd.f32 %v3713_v4, %v3712_v54  ;;  %v3715_v47 = vpop.f32.mrb[150].mxu0 }
 0x2bc   : > { %v3716_v7 = vpop.f32.mrb[151].mxu0  ;;  %v2683_v35 = vadd.f32 %v3605_v9, %v4815_v59 }
 0x2bd   : > { %v3717_v53 = vadd.f32 %v3716_v7, %v3715_v47  ;;  %v4909_v55 = vadd.f32 %v3714_v23, %v2680_v52 }
 0x2be   : > { %v3606_v8 = vpop.f32.mrb[120].mxu1 }
 0x2bf   : > { %v3607_v14 = vpop.f32.mrb[121].mxu1  ;;  %v4911_v31 = vadd.f32 %v3717_v53, %v2683_v35 }
 0x2c0   : > { %v3608_v12 = vadd.f32 %v3607_v14, %v3606_v8  ;;  %v3609_v42 = vpop.f32.mrb[122].mxu1 }
 0x2c1   : > { %v3718_v20 = vpop.f32.mrb[152].mxu0  ;;  %v3610_v62 = vpop.f32.mrb[123].mxu1 }
 0x2c2   : > { %v3719_v22 = vpop.f32.mrb[153].mxu0  ;;  %v2688_v39 = vadd.f32 %v3608_v12, %v4819_v5  ;;  %v3611_v30 = vadd.f32 %v3610_v62, %v3609_v42 }
 0x2c3   : > { %v3720_v25 = vadd.f32 %v3719_v22, %v3718_v20  ;;  %v3721_v40 = vpop.f32.mrb[154].mxu0 }
 0x2c4   : > { %v3722_v48 = vpop.f32.mrb[155].mxu0  ;;  %v2691_v59 = vadd.f32 %v3611_v30, %v4821_v44 }
 0x2c5   : > { %v3723_v1 = vadd.f32 %v3722_v48, %v3721_v40  ;;  %v4915_v60 = vadd.f32 %v3720_v25, %v2688_v39 }
 0x2c6   : > { %v3612_v19 = vpop.f32.mrb[124].mxu1 }
 0x2c7   : > { %v3613_v29 = vpop.f32.mrb[125].mxu1  ;;  %v4917_v36 = vadd.f32 %v3723_v1, %v2691_v59 }
 0x2c8   : > { %v3614_v46 = vadd.f32 %v3613_v29, %v3612_v19  ;;  %v3615_v17 = vpop.f32.mrb[126].mxu1 }
 0x2c9   : > { %v3724_v51 = vpop.f32.mrb[156].mxu0  ;;  %v3616_v63 = vpop.f32.mrb[127].mxu1 }
 0x2ca   : > { %v3725_v54 = vpop.f32.mrb[157].mxu0  ;;  %v2696_v5 = vadd.f32 %v3614_v46, %v4825_v11  ;;  %v3617_v57 = vadd.f32 %v3616_v63, %v3615_v17 }
 0x2cb   : > { %v3726_v4 = vadd.f32 %v3725_v54, %v3724_v51  ;;  %v3727_v52 = vpop.f32.mrb[158].mxu0 }
 0x2cc   : > { %v3728_v9 = vpop.f32.mrb[159].mxu0  ;;  %v2699_v44 = vadd.f32 %v3617_v57, %v4827_v15 }
 0x2cd   : > { %v3729_v23 = vadd.f32 %v3728_v9, %v3727_v52  ;;  %v4921_v47 = vadd.f32 %v3726_v4, %v2696_v5 }
 0x2ce   : > { %v3816_v7 = vpop.f32.mrb[128].mxu1 }
 0x2cf   : > { %v2922_v35 = vadd.f32 %v3816_v7, %v4849_v43  ;;  %v2913_v53 = vpop.f32.mrb[129].mxu1  ;;  %v4924_v8 = vadd.f32 %v3729_v23, %v2699_v44 }
 0x2d0   : > { %v2914_v14 = vadd.f32 %v2913_v53, %v4843_v3  ;;  %v3817_v12 = vpop.f32.mrb[130].mxu1 }
 0x2d1   : > { %v3812_v42 = vpop.f32.mrb[160].mxu0  ;;  %v2925_v11 = vadd.f32 %v3817_v12, %v4851_v37  ;;  %v2916_v20 = vpop.f32.mrb[131].mxu1  ;;  %v3030_v9 = vmax.f32 %v2922_v35, 0.0 }
 0x2d2   : > { %v2906_v62 = vadd.f32 %v3812_v42, %v4837_v34  ;;  %v2897_v22 = vpop.f32.mrb[161].mxu0  ;;  %v2917_v15 = vadd.f32 %v2916_v20, %v4845_v49  ;;  %v3028_v63 = vmax.f32 %v2914_v14, 0.0 }
 0x2d3   : > { %v2898_v39 = vadd.f32 %v2897_v22, %v4831_v61  ;;  %v3813_v30 = vpop.f32.mrb[162].mxu0  ;;  %v3031_v7 = vmax.f32 %v2925_v11, 0.0 }
 0x2d4   : > { %v2909_v43 = vadd.f32 %v3813_v30, %v4839_v45  ;;  %v2900_v25 = vpop.f32.mrb[163].mxu0  ;;  %v3026_v29 = vmax.f32 %v2906_v62, 0.0  ;;  %v3029_v5 = vmax.f32 %v2917_v15, 0.0 }
 0x2d5   : > { %v2901_v40 = vadd.f32 %v2900_v25, %v4833_v13  ;;  %v3024_v3 = vmax.f32 %v2898_v39, 0.0 }
 0x2d6   : > { %v3820_v48 = vpop.f32.mrb[132].mxu1  ;;  %v3027_v45 = vmax.f32 %v2909_v43, 0.0 }
 0x2d7   : > { %v3025_v59 = vmax.f32 %v2901_v40, 0.0  ;;  %v2938_v1 = vadd.f32 %v3820_v48, %v4861_v32  ;;  %v2929_v37 = vpop.f32.mrb[133].mxu1 }
 0x2d8   : > { %v2930_v19 = vadd.f32 %v2929_v37, %v4855_v24  ;;  %v3821_v34 = vpop.f32.mrb[134].mxu1 }
 0x2d9   : > { %v3056_v46 = vadd.f32 %v3025_v59, %v3024_v3  ;;  %v2941_v49 = vadd.f32 %v3821_v34, %v4863_v28  ;;  %v2932_v61 = vpop.f32.mrb[135].mxu1  ;;  %v3034_v35 = vmax.f32 %v2938_v1, 0.0 }
 0x2da   : > { %v2933_v17 = vadd.f32 %v2932_v61, %v4857_v2  ;;  %v3032_v14 = vmax.f32 %v2930_v19, 0.0 }
 0x2db   : > { %v3057_v51 = vadd.f32 %v3056_v46, %v3026_v29  ;;  %v3035_v11 = vmax.f32 %v2941_v49, 0.0 }
 0x2dc   : > { %v3033_v62 = vmax.f32 %v2933_v17, 0.0 }
 0x2dd   : > { %v3058_v13 = vadd.f32 %v3057_v51, %v3027_v45 }
 0x2de   : > { %v3824_v54 = vpop.f32.mrb[136].mxu1 }
 0x2df   : > { %v3059_v57 = vadd.f32 %v3058_v13, %v3028_v63  ;;  %v2954_v32 = vadd.f32 %v3824_v54, %v4873_v38  ;;  %v2945_v4 = vpop.f32.mrb[137].mxu1 }
 0x2e0   : > { %v2946_v24 = vadd.f32 %v2945_v4, %v4867_v0  ;;  %v3825_v52 = vpop.f32.mrb[138].mxu1 }
 0x2e1   : > { %v3060_v44 = vadd.f32 %v3059_v57, %v3029_v5  ;;  %v2957_v28 = vadd.f32 %v3825_v52, %v4875_v27  ;;  %v2948_v23 = vpop.f32.mrb[139].mxu1  ;;  %v3038_v1 = vmax.f32 %v2954_v32, 0.0 }
 0x2e2   : > { %v2949_v2 = vadd.f32 %v2948_v23, %v4869_v56  ;;  %v3036_v25 = vmax.f32 %v2946_v24, 0.0 }
 0x2e3   : > { %v3061_v53 = vadd.f32 %v3060_v44, %v3030_v9  ;;  %v3039_v46 = vmax.f32 %v2957_v28, 0.0 }
 0x2e4   : > { %v3037_v59 = vmax.f32 %v2949_v2, 0.0 }
 0x2e5   : > { %v3062_v12 = vadd.f32 %v3061_v53, %v3031_v7 }
 0x2e6   : > { %v3828_v42 = vpop.f32.mrb[140].mxu1 }
 0x2e7   : > { %v3063_v20 = vadd.f32 %v3062_v12, %v3032_v14  ;;  %v2970_v38 = vadd.f32 %v3828_v42, %v4885_v33  ;;  %v2961_v22 = vpop.f32.mrb[141].mxu1 }
 0x2e8   : > { %v2962_v0 = vadd.f32 %v2961_v22, %v4879_v50  ;;  %v3829_v15 = vpop.f32.mrb[142].mxu1 }
 0x2e9   : > { %v3064_v39 = vadd.f32 %v3063_v20, %v3033_v62  ;;  %v2973_v27 = vadd.f32 %v3829_v15, %v4887_v21  ;;  %v2964_v30 = vpop.f32.mrb[143].mxu1  ;;  %v3042_v5 = vmax.f32 %v2970_v38, 0.0 }
 0x2ea   : > { %v2965_v56 = vadd.f32 %v2964_v30, %v4881_v58  ;;  %v3040_v61 = vmax.f32 %v2962_v0, 0.0 }
 0x2eb   : > { %v3065_v43 = vadd.f32 %v3064_v39, %v3034_v35  ;;  %v3043_v4 = vmax.f32 %v2973_v27, 0.0 }
 0x2ec   : > { %v3041_v63 = vmax.f32 %v2965_v56, 0.0 }
 0x2ed   : > { %v3066_v40 = vadd.f32 %v3065_v43, %v3035_v11 }
 0x2ee   : > { %v3832_v48 = vpop.f32.mrb[144].mxu1 }
 0x2ef   : > { %v3067_v3 = vadd.f32 %v3066_v40, %v3036_v25  ;;  %v2986_v33 = vadd.f32 %v3832_v48, %v4897_v6  ;;  %v2977_v37 = vpop.f32.mrb[145].mxu1 }
 0x2f0   : > { %v2978_v50 = vadd.f32 %v2977_v37, %v4891_v10  ;;  %v3833_v19 = vpop.f32.mrb[146].mxu1 }
 0x2f1   : > { %v3068_v34 = vadd.f32 %v3067_v3, %v3037_v59  ;;  %v2989_v21 = vadd.f32 %v3833_v19, %v4899_v18  ;;  %v2980_v29 = vpop.f32.mrb[147].mxu1  ;;  %v3046_v53 = vmax.f32 %v2986_v33, 0.0 }
 0x2f2   : > { %v2981_v58 = vadd.f32 %v2980_v29, %v4893_v41  ;;  %v3044_v52 = vmax.f32 %v2978_v50, 0.0 }
 0x2f3   : > { %v3069_v49 = vadd.f32 %v3068_v34, %v3038_v1  ;;  %v3047_v42 = vmax.f32 %v2989_v21, 0.0 }
 0x2f4   : > { %v3045_v23 = vmax.f32 %v2981_v58, 0.0 }
 0x2f5   : > { %v3070_v17 = vadd.f32 %v3069_v49, %v3039_v46 }
 0x2f6   : > { %v3836_v45 = vpop.f32.mrb[148].mxu1 }
 0x2f7   : > { %v3071_v51 = vadd.f32 %v3070_v17, %v3040_v61  ;;  %v3002_v6 = vadd.f32 %v3836_v45, %v4909_v55  ;;  %v2993_v13 = vpop.f32.mrb[149].mxu1 }
 0x2f8   : > { %v2994_v10 = vadd.f32 %v2993_v13, %v4903_v16  ;;  %v3837_v54 = vpop.f32.mrb[150].mxu1 }
 0x2f9   : > { %v3072_v57 = vadd.f32 %v3071_v51, %v3041_v63  ;;  %v3005_v18 = vadd.f32 %v3837_v54, %v4911_v31  ;;  %v2996_v32 = vpop.f32.mrb[151].mxu1  ;;  %v3050_v15 = vmax.f32 %v3002_v6, 0.0 }
 0x2fa   : > { %v2997_v41 = vadd.f32 %v2996_v32, %v4905_v26  ;;  %v3048_v62 = vmax.f32 %v2994_v10, 0.0 }
 0x2fb   : > { %v3073_v24 = vadd.f32 %v3072_v57, %v3042_v5 }
 0x2fc   : > { %v3049_v0 = vmax.f32 %v2997_v41, 0.0 }
 0x2fd   : > { %v3074_v9 = vadd.f32 %v3073_v24, %v3043_v4 }
 0x2fe   : > { %v3840_v44 = vpop.f32.mrb[152].mxu1 }
 0x2ff   : > { %v3075_v28 = vadd.f32 %v3074_v9, %v3044_v52  ;;  %v3018_v55 = vadd.f32 %v3840_v44, %v4921_v47  ;;  %v3009_v2 = vpop.f32.mrb[153].mxu1  ;;  %v3051_v47 = vmax.f32 %v3005_v18, 0.0 }
 0x300   : > { %v3010_v16 = vadd.f32 %v3009_v2, %v4915_v60  ;;  %v3841_v7 = vpop.f32.mrb[154].mxu1 }
 0x301   : > { %v3076_v14 = vadd.f32 %v3075_v28, %v3045_v23  ;;  %v3021_v31 = vadd.f32 %v3841_v7, %v4924_v8  ;;  %v3012_v12 = vpop.f32.mrb[155].mxu1  ;;  %v3054_v11 = vmax.f32 %v3018_v55, 0.0 }
 0x302   : > { %v3013_v26 = vadd.f32 %v3012_v12, %v4917_v36  ;;  %v3052_v60 = vmax.f32 %v3010_v16, 0.0 }
 0x303   : > { %v3077_v20 = vadd.f32 %v3076_v14, %v3046_v53  ;;  %v3055_v43 = vmax.f32 %v3021_v31, 0.0 }
 0x304   : > { %v3053_v56 = vmax.f32 %v3013_v26, 0.0 }
 0x305   : > { %v3078_v38 = vadd.f32 %v3077_v20, %v3047_v42 }
 0x307   : > { %v3079_v22 = vadd.f32 %v3078_v38, %v3048_v62 }
 0x309   : > { %v3080_v35 = vadd.f32 %v3079_v22, %v3049_v0 }
 0x30b   : > { %v3081_v39 = vadd.f32 %v3080_v35, %v3050_v15 }
 0x30d   : > { %v3082_v27 = vadd.f32 %v3081_v39, %v3051_v47 }
 0x30f   : > { %v3083_v30 = vadd.f32 %v3082_v27, %v3052_v60 }
 0x311   : > { %v3084_v8 = vadd.f32 %v3083_v30, %v3053_v56 }
 0x313   : > { %v3085_v25 = vadd.f32 %v3084_v8, %v3054_v11 }
 0x315   : > { %v3086_v36 = vadd.f32 %v3085_v25, %v3055_v43 }
 0x317   : > { %v3087_v40 = vrot.slane %v3086_v36, 4 }
 0x319   : > { %v3088_v48 = vadd.f32 %v3087_v40, %v3086_v36 }
 0x31b   : > { %v3089_v3 = vrot.slane %v3088_v48, 2 }
 0x31d   : > { %v3090_v59 = vadd.f32 %v3089_v3, %v3088_v48 }
 0x31f   : > { %v3091_v33 = vrot.slane %v3090_v59, 1 }
 0x321   : > { %v3092_v37 = vadd.f32 %v3091_v33, %v3090_v59 }
 0x323   : > { %v3093_v50 = vmul.f32 0.00390625, %v3092_v37 }
 0x325   : > { %3094 = vst [vmem:[%s220_s22] sm:$0x1] %v3093_v50 }
 0x326 PF: > { %s15_s18 = sadd.s32 1, %s3966_s18  }
 0x327   : > { %p12_p4 = scmp.ge.s32.totalorder %s15_s18, 4  }
 0x329   :  { %14 = sbr.rel (!%p12_p4) target bundleno = 1 (0x1), region = 71 }

</bundles_post_ra>
